<compile_context>
chip_gen: v7x
topology: tpu7x:2x2x1
jax: 0.10.0
libtpu: 0.0.40
codegen_flags: <defaults>
</compile_context>

<pallas_src>
import jax
import jax.numpy as jnp
from jax.experimental import pallas as pl
from jax.experimental.pallas import tpu as pltpu


def _pts_kernel(x_ref, w0_ref, b0_ref, w1_ref, b1_ref, w2_ref, b2_ref, out_ref):
    x = x_ref[...].astype(jnp.float32)                 # (TB, Lp)
    tb, lp = x.shape
    n_nodes = b0_ref.shape[0]                          # H
    top_k = w0_ref.shape[0] // n_nodes                 # K

    # ---- top-k values along the lane axis (descending).  Exact torch.topk duplicate
    #      handling: mask only the left-most occurrence of the current max.
    lane_iota = jax.lax.broadcasted_iota(jnp.int32, (tb, lp), 1)
    neg_inf = jnp.float32(-jnp.inf)
    work = x
    top_vals = []
    for _ in range(top_k):
        m = jnp.max(work, axis=1, keepdims=True)       # (TB, 1)  XLU reduce
        cand = jnp.where(work == m, lane_iota, lp)     # leftmost tie-break key
        idx = jnp.min(cand, axis=1, keepdims=True)     # (TB, 1)  XLU reduce
        work = jnp.where(cand == idx, neg_inf, work)   # knock out exactly one element
        top_vals.append(m)
    m0 = top_vals[0]                                   # row max of x (reused below)

    # ---- tiny MLP -> per-row temperature.  Unrolled broadcast-FMAs on the VPU with
    #      scalar weights from SMEM (shapes ~25x below the MXU tile, so skip the MXU).
    h1 = []
    for j in range(n_nodes):
        acc = top_vals[0] * w0_ref[j] + b0_ref[j]
        for k in range(1, top_k):
            acc = acc + top_vals[k] * w0_ref[k * n_nodes + j]
        h1.append(jnp.maximum(acc, 0.0))
    h2 = []
    for j in range(n_nodes):
        acc = h1[0] * w1_ref[j] + b1_ref[j]
        for i in range(1, n_nodes):
            acc = acc + h1[i] * w1_ref[i * n_nodes + j]
        h2.append(jnp.maximum(acc, 0.0))
    temp = h2[0] * w2_ref[0] + b2_ref[0]
    for i in range(1, n_nodes):
        temp = temp + h2[i] * w2_ref[i]
    temp = jnp.clip(jnp.abs(temp), 1e-12, 1e12)        # (TB, 1), strictly > 0
    inv_temp = pl.reciprocal(temp, approx=False)       # EUP, (TB, 1)

    # ---- temperature-scaled softmax.  Since temp > 0, max(x/temp) = m0/temp, so reuse
    #      m0 as the shift; padded lanes (-1e30 fill) give exp(...) == 0 exactly.
    e = jnp.exp((x - m0) * inv_temp)
    denom = jnp.sum(e, axis=1, keepdims=True)          # (TB, 1)  XLU reduce
    out_ref[...] = (e * pl.reciprocal(denom, approx=False)).astype(out_ref.dtype)


def _round_up(n, m):
    return (n + m - 1) // m * m


def pts_forward(x, params, *, top_k=10, batch_tile=None):
    """x: (B, L) logits.  params: (in, out)-layout weights + (1, out) biases."""
    B, L = x.shape
    assert L >= top_k
    w0, b0, w1, b1, w2, b2 = (params[k] for k in ("w0", "b0", "w1", "b1", "w2", "b2"))
    n_nodes = w0.shape[1]
    assert w0.shape == (top_k, n_nodes)

    Lp = _round_up(L, 128)                 # lane-dense in/out tiles (no masked stores)
    Bp8 = _round_up(B, 8)
    if batch_tile is None:
        # 2 input + 2 output double-buffered f32 tiles within ~10 MiB of VMEM.
        budget_bytes = 10 * 1024 * 1024
        bt = max(8, min(1024, (budget_bytes // (Lp * 4 * 4)) // 8 * 8))
        bt = min(bt, Bp8)
        if Bp8 > 8 and Bp8 // bt < 2:      # keep >= 2 grid steps for v7x megacore
            bt = max(8, (_round_up(B, 16) // 2) // 8 * 8)
    else:
        bt = min(batch_tile, Bp8)
    Bp = _round_up(B, bt)

    xp = x
    if Lp != L:   # pad logit axis; huge-negative fill keeps top-k and softmax exact
        xp = jnp.pad(xp, ((0, 0), (0, Lp - L)), constant_values=-1e30)
    if Bp != B:
        xp = jnp.pad(xp, ((0, Bp - B), (0, 0)))

    # MLP params as flat scalar tables in SMEM (tiny; read scalar-by-scalar).
    flat = lambda a: a.reshape(-1)
    smem = pl.BlockSpec(memory_space=pltpu.MemorySpace.SMEM)

    out = pl.pallas_call(
        _pts_kernel,
        out_shape=jax.ShapeDtypeStruct((Bp, Lp), x.dtype),
        grid_spec=pltpu.PrefetchScalarGridSpec(
            num_scalar_prefetch=0,
            grid=(Bp // bt,),
            in_specs=[
                pl.BlockSpec((bt, Lp), lambda i: (i, 0)),    # x tile (VMEM)
                smem, smem, smem, smem, smem, smem,          # W0 b0 W1 b1 W2 b2
            ],
            out_specs=pl.BlockSpec((bt, Lp), lambda i: (i, 0)),
        ),
        compiler_params=pltpu.CompilerParams(
            dimension_semantics=("parallel",),
            vmem_limit_bytes=32 * 1024 * 1024),
    )(xp, flat(w0), flat(b0), flat(w1), flat(b1), flat(w2), flat(b2))

    if (Bp, Lp) != (B, L):
        out = out[:B, :L]
    return out


def init_params(key, *, top_k=10, n_nodes=5):
    """Deterministic nn.Linear-style init: U(-1/sqrt(fan_in), 1/sqrt(fan_in))."""
    ks = jax.random.split(key, 6)

    def lin(kw, kb, fan_in, fan_out):
        bound = 1.0 / jnp.sqrt(float(fan_in))
        w = jax.random.uniform(kw, (fan_in, fan_out), jnp.float32, -bound, bound)
        b = jax.random.uniform(kb, (1, fan_out), jnp.float32, -bound, bound)
        return w, b

    w0, b0 = lin(ks[0], ks[1], top_k, n_nodes)
    w1, b1 = lin(ks[2], ks[3], n_nodes, n_nodes)
    w2, b2 = lin(ks[4], ks[5], n_nodes, 1)
    return dict(w0=w0, b0=b0, w1=w1, b1=b1, w2=w2, b2=b2)


def pts_forward_ref(x, params, *, top_k=10):
    """Pure-JAX reference for correctness checking."""
    t, _ = jax.lax.top_k(x, top_k)
    h = jnp.maximum(t @ params["w0"] + params["b0"], 0.0)
    h = jnp.maximum(h @ params["w1"] + params["b1"], 0.0)
    temp = h @ params["w2"] + params["b2"]
    temp = jnp.clip(jnp.abs(temp), 1e-12, 1e12)
    return jax.nn.softmax(x / temp, axis=1)


if __name__ == "__main__":
    B, L = 16, 100            # small demo: batch 16, 100-class logits (exercises lane pad)
    TOP_K, N_NODES = 10, 5    # nlayers=2 default -> [K->5, 5->5, 5->1]

    key = jax.random.PRNGKey(0)
    kx, kp = jax.random.split(key)
    x = jax.random.normal(kx, (B, L), dtype=jnp.float32) * 3.0
    params = init_params(kp, top_k=TOP_K, n_nodes=N_NODES)

    out = jax.jit(lambda xx, pp: pts_forward(xx, pp, top_k=TOP_K))(x, params)
    out = jax.block_until_ready(out)

    ref = pts_forward_ref(x, params, top_k=TOP_K)
    assert out.shape == (B, L) and out.dtype == x.dtype
    assert jnp.allclose(out, ref, rtol=1e-5, atol=1e-6), "mismatch vs reference"

    print("KERNEL_OK")
</pallas_src>

<mosaic_0001>
module attributes {stable_mosaic.version = 11 : i64} {
  func.func @_pts_kernel(%arg0: i32, %arg1: memref<8x128xf32, #tpu.memory_space<vmem>>, %arg2: memref<50xf32, #tpu.memory_space<smem>>, %arg3: memref<5xf32, #tpu.memory_space<smem>>, %arg4: memref<25xf32, #tpu.memory_space<smem>>, %arg5: memref<5xf32, #tpu.memory_space<smem>>, %arg6: memref<5xf32, #tpu.memory_space<smem>>, %arg7: memref<1xf32, #tpu.memory_space<smem>>, %arg8: memref<8x128xf32, #tpu.memory_space<vmem>>) attributes {dimension_semantics = [#tpu.dimension_semantics<parallel>], iteration_bounds = array<i64: 2>, scalar_prefetch = 0 : i64, scratch_operands = 0 : i64, tpu.core_type = #tpu.core_type<tc>, window_params = [{transform_indices = @transform_0, window_bounds = array<i64: 8, 128>}, {transform_indices = @transform_1, window_bounds = array<i64: 50>}, {transform_indices = @transform_2, window_bounds = array<i64: 5>}, {transform_indices = @transform_3, window_bounds = array<i64: 25>}, {transform_indices = @transform_4, window_bounds = array<i64: 5>}, {transform_indices = @transform_5, window_bounds = array<i64: 5>}, {transform_indices = @transform_6, window_bounds = array<i64: 1>}, {transform_indices = @transform_7, window_bounds = array<i64: 8, 128>}]} {
    %c0 = arith.constant 0 : index
    %c0_0 = arith.constant 0 : index
    %0 = vector.load %arg1[%c0, %c0_0] : memref<8x128xf32, #tpu.memory_space<vmem>>, vector<8x128xf32>
    %1 = tpu.iota {dimensions = array<i32: 1>} : vector<8x128xi32>
    %cst = arith.constant dense<0xFF800000> : vector<8xf32>
    %2 = vector.multi_reduction <maximumf>, %0, %cst [1] : vector<8x128xf32> to vector<8xf32>
    %3 = vector.shape_cast %2 : vector<8xf32> to vector<8x1xf32>
    %4 = vector.broadcast %3 : vector<8x1xf32> to vector<8x128xf32>
    %5 = arith.cmpf oeq, %0, %4 : vector<8x128xf32>
    %c128_i32 = arith.constant 128 : i32
    %6 = vector.broadcast %c128_i32 : i32 to vector<8x128xi32>
    %7 = arith.select %5, %1, %6 : vector<8x128xi1>, vector<8x128xi32>
    %cst_1 = arith.constant dense<2147483647> : vector<8xi32>
    %8 = vector.multi_reduction <minsi>, %7, %cst_1 [1] : vector<8x128xi32> to vector<8xi32>
    %9 = vector.shape_cast %8 : vector<8xi32> to vector<8x1xi32>
    %10 = vector.broadcast %9 : vector<8x1xi32> to vector<8x128xi32>
    %11 = arith.cmpi eq, %7, %10 : vector<8x128xi32>
    %cst_2 = arith.constant 0xFF800000 : f32
    %12 = vector.broadcast %cst_2 : f32 to vector<8x128xf32>
    %13 = arith.select %11, %12, %0 : vector<8x128xi1>, vector<8x128xf32>
    %cst_3 = arith.constant dense<0xFF800000> : vector<8xf32>
    %14 = vector.multi_reduction <maximumf>, %13, %cst_3 [1] : vector<8x128xf32> to vector<8xf32>
    %15 = vector.shape_cast %14 : vector<8xf32> to vector<8x1xf32>
    %16 = vector.broadcast %15 : vector<8x1xf32> to vector<8x128xf32>
    %17 = arith.cmpf oeq, %13, %16 : vector<8x128xf32>
    %c128_i32_4 = arith.constant 128 : i32
    %18 = vector.broadcast %c128_i32_4 : i32 to vector<8x128xi32>
    %19 = arith.select %17, %1, %18 : vector<8x128xi1>, vector<8x128xi32>
    %cst_5 = arith.constant dense<2147483647> : vector<8xi32>
    %20 = vector.multi_reduction <minsi>, %19, %cst_5 [1] : vector<8x128xi32> to vector<8xi32>
    %21 = vector.shape_cast %20 : vector<8xi32> to vector<8x1xi32>
    %22 = vector.broadcast %21 : vector<8x1xi32> to vector<8x128xi32>
    %23 = arith.cmpi eq, %19, %22 : vector<8x128xi32>
    %cst_6 = arith.constant 0xFF800000 : f32
    %24 = vector.broadcast %cst_6 : f32 to vector<8x128xf32>
    %25 = arith.select %23, %24, %13 : vector<8x128xi1>, vector<8x128xf32>
    %cst_7 = arith.constant dense<0xFF800000> : vector<8xf32>
    %26 = vector.multi_reduction <maximumf>, %25, %cst_7 [1] : vector<8x128xf32> to vector<8xf32>
    %27 = vector.shape_cast %26 : vector<8xf32> to vector<8x1xf32>
    %28 = vector.broadcast %27 : vector<8x1xf32> to vector<8x128xf32>
    %29 = arith.cmpf oeq, %25, %28 : vector<8x128xf32>
    %c128_i32_8 = arith.constant 128 : i32
    %30 = vector.broadcast %c128_i32_8 : i32 to vector<8x128xi32>
    %31 = arith.select %29, %1, %30 : vector<8x128xi1>, vector<8x128xi32>
    %cst_9 = arith.constant dense<2147483647> : vector<8xi32>
    %32 = vector.multi_reduction <minsi>, %31, %cst_9 [1] : vector<8x128xi32> to vector<8xi32>
    %33 = vector.shape_cast %32 : vector<8xi32> to vector<8x1xi32>
    %34 = vector.broadcast %33 : vector<8x1xi32> to vector<8x128xi32>
    %35 = arith.cmpi eq, %31, %34 : vector<8x128xi32>
    %cst_10 = arith.constant 0xFF800000 : f32
    %36 = vector.broadcast %cst_10 : f32 to vector<8x128xf32>
    %37 = arith.select %35, %36, %25 : vector<8x128xi1>, vector<8x128xf32>
    %cst_11 = arith.constant dense<0xFF800000> : vector<8xf32>
    %38 = vector.multi_reduction <maximumf>, %37, %cst_11 [1] : vector<8x128xf32> to vector<8xf32>
    %39 = vector.shape_cast %38 : vector<8xf32> to vector<8x1xf32>
    %40 = vector.broadcast %39 : vector<8x1xf32> to vector<8x128xf32>
    %41 = arith.cmpf oeq, %37, %40 : vector<8x128xf32>
    %c128_i32_12 = arith.constant 128 : i32
    %42 = vector.broadcast %c128_i32_12 : i32 to vector<8x128xi32>
    %43 = arith.select %41, %1, %42 : vector<8x128xi1>, vector<8x128xi32>
    %cst_13 = arith.constant dense<2147483647> : vector<8xi32>
    %44 = vector.multi_reduction <minsi>, %43, %cst_13 [1] : vector<8x128xi32> to vector<8xi32>
    %45 = vector.shape_cast %44 : vector<8xi32> to vector<8x1xi32>
    %46 = vector.broadcast %45 : vector<8x1xi32> to vector<8x128xi32>
    %47 = arith.cmpi eq, %43, %46 : vector<8x128xi32>
    %cst_14 = arith.constant 0xFF800000 : f32
    %48 = vector.broadcast %cst_14 : f32 to vector<8x128xf32>
    %49 = arith.select %47, %48, %37 : vector<8x128xi1>, vector<8x128xf32>
    %cst_15 = arith.constant dense<0xFF800000> : vector<8xf32>
    %50 = vector.multi_reduction <maximumf>, %49, %cst_15 [1] : vector<8x128xf32> to vector<8xf32>
    %51 = vector.shape_cast %50 : vector<8xf32> to vector<8x1xf32>
    %52 = vector.broadcast %51 : vector<8x1xf32> to vector<8x128xf32>
    %53 = arith.cmpf oeq, %49, %52 : vector<8x128xf32>
    %c128_i32_16 = arith.constant 128 : i32
    %54 = vector.broadcast %c128_i32_16 : i32 to vector<8x128xi32>
    %55 = arith.select %53, %1, %54 : vector<8x128xi1>, vector<8x128xi32>
    %cst_17 = arith.constant dense<2147483647> : vector<8xi32>
    %56 = vector.multi_reduction <minsi>, %55, %cst_17 [1] : vector<8x128xi32> to vector<8xi32>
    %57 = vector.shape_cast %56 : vector<8xi32> to vector<8x1xi32>
    %58 = vector.broadcast %57 : vector<8x1xi32> to vector<8x128xi32>
    %59 = arith.cmpi eq, %55, %58 : vector<8x128xi32>
    %cst_18 = arith.constant 0xFF800000 : f32
    %60 = vector.broadcast %cst_18 : f32 to vector<8x128xf32>
    %61 = arith.select %59, %60, %49 : vector<8x128xi1>, vector<8x128xf32>
    %cst_19 = arith.constant dense<0xFF800000> : vector<8xf32>
    %62 = vector.multi_reduction <maximumf>, %61, %cst_19 [1] : vector<8x128xf32> to vector<8xf32>
    %63 = vector.shape_cast %62 : vector<8xf32> to vector<8x1xf32>
    %64 = vector.broadcast %63 : vector<8x1xf32> to vector<8x128xf32>
    %65 = arith.cmpf oeq, %61, %64 : vector<8x128xf32>
    %c128_i32_20 = arith.constant 128 : i32
    %66 = vector.broadcast %c128_i32_20 : i32 to vector<8x128xi32>
    %67 = arith.select %65, %1, %66 : vector<8x128xi1>, vector<8x128xi32>
    %cst_21 = arith.constant dense<2147483647> : vector<8xi32>
    %68 = vector.multi_reduction <minsi>, %67, %cst_21 [1] : vector<8x128xi32> to vector<8xi32>
    %69 = vector.shape_cast %68 : vector<8xi32> to vector<8x1xi32>
    %70 = vector.broadcast %69 : vector<8x1xi32> to vector<8x128xi32>
    %71 = arith.cmpi eq, %67, %70 : vector<8x128xi32>
    %cst_22 = arith.constant 0xFF800000 : f32
    %72 = vector.broadcast %cst_22 : f32 to vector<8x128xf32>
    %73 = arith.select %71, %72, %61 : vector<8x128xi1>, vector<8x128xf32>
    %cst_23 = arith.constant dense<0xFF800000> : vector<8xf32>
    %74 = vector.multi_reduction <maximumf>, %73, %cst_23 [1] : vector<8x128xf32> to vector<8xf32>
    %75 = vector.shape_cast %74 : vector<8xf32> to vector<8x1xf32>
    %76 = vector.broadcast %75 : vector<8x1xf32> to vector<8x128xf32>
    %77 = arith.cmpf oeq, %73, %76 : vector<8x128xf32>
    %c128_i32_24 = arith.constant 128 : i32
    %78 = vector.broadcast %c128_i32_24 : i32 to vector<8x128xi32>
    %79 = arith.select %77, %1, %78 : vector<8x128xi1>, vector<8x128xi32>
    %cst_25 = arith.constant dense<2147483647> : vector<8xi32>
    %80 = vector.multi_reduction <minsi>, %79, %cst_25 [1] : vector<8x128xi32> to vector<8xi32>
    %81 = vector.shape_cast %80 : vector<8xi32> to vector<8x1xi32>
    %82 = vector.broadcast %81 : vector<8x1xi32> to vector<8x128xi32>
    %83 = arith.cmpi eq, %79, %82 : vector<8x128xi32>
    %cst_26 = arith.constant 0xFF800000 : f32
    %84 = vector.broadcast %cst_26 : f32 to vector<8x128xf32>
    %85 = arith.select %83, %84, %73 : vector<8x128xi1>, vector<8x128xf32>
    %cst_27 = arith.constant dense<0xFF800000> : vector<8xf32>
    %86 = vector.multi_reduction <maximumf>, %85, %cst_27 [1] : vector<8x128xf32> to vector<8xf32>
    %87 = vector.shape_cast %86 : vector<8xf32> to vector<8x1xf32>
    %88 = vector.broadcast %87 : vector<8x1xf32> to vector<8x128xf32>
    %89 = arith.cmpf oeq, %85, %88 : vector<8x128xf32>
    %c128_i32_28 = arith.constant 128 : i32
    %90 = vector.broadcast %c128_i32_28 : i32 to vector<8x128xi32>
    %91 = arith.select %89, %1, %90 : vector<8x128xi1>, vector<8x128xi32>
    %cst_29 = arith.constant dense<2147483647> : vector<8xi32>
    %92 = vector.multi_reduction <minsi>, %91, %cst_29 [1] : vector<8x128xi32> to vector<8xi32>
    %93 = vector.shape_cast %92 : vector<8xi32> to vector<8x1xi32>
    %94 = vector.broadcast %93 : vector<8x1xi32> to vector<8x128xi32>
    %95 = arith.cmpi eq, %91, %94 : vector<8x128xi32>
    %cst_30 = arith.constant 0xFF800000 : f32
    %96 = vector.broadcast %cst_30 : f32 to vector<8x128xf32>
    %97 = arith.select %95, %96, %85 : vector<8x128xi1>, vector<8x128xf32>
    %cst_31 = arith.constant dense<0xFF800000> : vector<8xf32>
    %98 = vector.multi_reduction <maximumf>, %97, %cst_31 [1] : vector<8x128xf32> to vector<8xf32>
    %99 = vector.shape_cast %98 : vector<8xf32> to vector<8x1xf32>
    %100 = vector.broadcast %99 : vector<8x1xf32> to vector<8x128xf32>
    %101 = arith.cmpf oeq, %97, %100 : vector<8x128xf32>
    %c128_i32_32 = arith.constant 128 : i32
    %102 = vector.broadcast %c128_i32_32 : i32 to vector<8x128xi32>
    %103 = arith.select %101, %1, %102 : vector<8x128xi1>, vector<8x128xi32>
    %cst_33 = arith.constant dense<2147483647> : vector<8xi32>
    %104 = vector.multi_reduction <minsi>, %103, %cst_33 [1] : vector<8x128xi32> to vector<8xi32>
    %105 = vector.shape_cast %104 : vector<8xi32> to vector<8x1xi32>
    %106 = vector.broadcast %105 : vector<8x1xi32> to vector<8x128xi32>
    %107 = arith.cmpi eq, %103, %106 : vector<8x128xi32>
    %cst_34 = arith.constant 0xFF800000 : f32
    %108 = vector.broadcast %cst_34 : f32 to vector<8x128xf32>
    %109 = arith.select %107, %108, %97 : vector<8x128xi1>, vector<8x128xf32>
    %cst_35 = arith.constant dense<0xFF800000> : vector<8xf32>
    %110 = vector.multi_reduction <maximumf>, %109, %cst_35 [1] : vector<8x128xf32> to vector<8xf32>
    %111 = vector.shape_cast %110 : vector<8xf32> to vector<8x1xf32>
    %c0_36 = arith.constant 0 : index
    %112 = memref.load %arg2[%c0_36] : memref<50xf32, #tpu.memory_space<smem>>
    %113 = vector.broadcast %112 : f32 to vector<8x1xf32>
    %114 = arith.mulf %3, %113 : vector<8x1xf32>
    %c0_37 = arith.constant 0 : index
    %115 = memref.load %arg3[%c0_37] : memref<5xf32, #tpu.memory_space<smem>>
    %116 = vector.broadcast %115 : f32 to vector<8x1xf32>
    %117 = arith.addf %114, %116 : vector<8x1xf32>
    %c5 = arith.constant 5 : index
    %118 = memref.load %arg2[%c5] : memref<50xf32, #tpu.memory_space<smem>>
    %119 = vector.broadcast %118 : f32 to vector<8x1xf32>
    %120 = arith.mulf %15, %119 : vector<8x1xf32>
    %121 = arith.addf %117, %120 : vector<8x1xf32>
    %c10 = arith.constant 10 : index
    %122 = memref.load %arg2[%c10] : memref<50xf32, #tpu.memory_space<smem>>
    %123 = vector.broadcast %122 : f32 to vector<8x1xf32>
    %124 = arith.mulf %27, %123 : vector<8x1xf32>
    %125 = arith.addf %121, %124 : vector<8x1xf32>
    %c15 = arith.constant 15 : index
    %126 = memref.load %arg2[%c15] : memref<50xf32, #tpu.memory_space<smem>>
    %127 = vector.broadcast %126 : f32 to vector<8x1xf32>
    %128 = arith.mulf %39, %127 : vector<8x1xf32>
    %129 = arith.addf %125, %128 : vector<8x1xf32>
    %c20 = arith.constant 20 : index
    %130 = memref.load %arg2[%c20] : memref<50xf32, #tpu.memory_space<smem>>
    %131 = vector.broadcast %130 : f32 to vector<8x1xf32>
    %132 = arith.mulf %51, %131 : vector<8x1xf32>
    %133 = arith.addf %129, %132 : vector<8x1xf32>
    %c25 = arith.constant 25 : index
    %134 = memref.load %arg2[%c25] : memref<50xf32, #tpu.memory_space<smem>>
    %135 = vector.broadcast %134 : f32 to vector<8x1xf32>
    %136 = arith.mulf %63, %135 : vector<8x1xf32>
    %137 = arith.addf %133, %136 : vector<8x1xf32>
    %c30 = arith.constant 30 : index
    %138 = memref.load %arg2[%c30] : memref<50xf32, #tpu.memory_space<smem>>
    %139 = vector.broadcast %138 : f32 to vector<8x1xf32>
    %140 = arith.mulf %75, %139 : vector<8x1xf32>
    %141 = arith.addf %137, %140 : vector<8x1xf32>
    %c35 = arith.constant 35 : index
    %142 = memref.load %arg2[%c35] : memref<50xf32, #tpu.memory_space<smem>>
    %143 = vector.broadcast %142 : f32 to vector<8x1xf32>
    %144 = arith.mulf %87, %143 : vector<8x1xf32>
    %145 = arith.addf %141, %144 : vector<8x1xf32>
    %c40 = arith.constant 40 : index
    %146 = memref.load %arg2[%c40] : memref<50xf32, #tpu.memory_space<smem>>
    %147 = vector.broadcast %146 : f32 to vector<8x1xf32>
    %148 = arith.mulf %99, %147 : vector<8x1xf32>
    %149 = arith.addf %145, %148 : vector<8x1xf32>
    %c45 = arith.constant 45 : index
    %150 = memref.load %arg2[%c45] : memref<50xf32, #tpu.memory_space<smem>>
    %151 = vector.broadcast %150 : f32 to vector<8x1xf32>
    %152 = arith.mulf %111, %151 : vector<8x1xf32>
    %153 = arith.addf %149, %152 : vector<8x1xf32>
    %cst_38 = arith.constant 0.000000e+00 : f32
    %154 = vector.broadcast %cst_38 : f32 to vector<8x1xf32>
    %155 = arith.maximumf %153, %154 : vector<8x1xf32>
    %c1 = arith.constant 1 : index
    %156 = memref.load %arg2[%c1] : memref<50xf32, #tpu.memory_space<smem>>
    %157 = vector.broadcast %156 : f32 to vector<8x1xf32>
    %158 = arith.mulf %3, %157 : vector<8x1xf32>
    %c1_39 = arith.constant 1 : index
    %159 = memref.load %arg3[%c1_39] : memref<5xf32, #tpu.memory_space<smem>>
    %160 = vector.broadcast %159 : f32 to vector<8x1xf32>
    %161 = arith.addf %158, %160 : vector<8x1xf32>
    %c6 = arith.constant 6 : index
    %162 = memref.load %arg2[%c6] : memref<50xf32, #tpu.memory_space<smem>>
    %163 = vector.broadcast %162 : f32 to vector<8x1xf32>
    %164 = arith.mulf %15, %163 : vector<8x1xf32>
    %165 = arith.addf %161, %164 : vector<8x1xf32>
    %c11 = arith.constant 11 : index
    %166 = memref.load %arg2[%c11] : memref<50xf32, #tpu.memory_space<smem>>
    %167 = vector.broadcast %166 : f32 to vector<8x1xf32>
    %168 = arith.mulf %27, %167 : vector<8x1xf32>
    %169 = arith.addf %165, %168 : vector<8x1xf32>
    %c16 = arith.constant 16 : index
    %170 = memref.load %arg2[%c16] : memref<50xf32, #tpu.memory_space<smem>>
    %171 = vector.broadcast %170 : f32 to vector<8x1xf32>
    %172 = arith.mulf %39, %171 : vector<8x1xf32>
    %173 = arith.addf %169, %172 : vector<8x1xf32>
    %c21 = arith.constant 21 : index
    %174 = memref.load %arg2[%c21] : memref<50xf32, #tpu.memory_space<smem>>
    %175 = vector.broadcast %174 : f32 to vector<8x1xf32>
    %176 = arith.mulf %51, %175 : vector<8x1xf32>
    %177 = arith.addf %173, %176 : vector<8x1xf32>
    %c26 = arith.constant 26 : index
    %178 = memref.load %arg2[%c26] : memref<50xf32, #tpu.memory_space<smem>>
    %179 = vector.broadcast %178 : f32 to vector<8x1xf32>
    %180 = arith.mulf %63, %179 : vector<8x1xf32>
    %181 = arith.addf %177, %180 : vector<8x1xf32>
    %c31 = arith.constant 31 : index
    %182 = memref.load %arg2[%c31] : memref<50xf32, #tpu.memory_space<smem>>
    %183 = vector.broadcast %182 : f32 to vector<8x1xf32>
    %184 = arith.mulf %75, %183 : vector<8x1xf32>
    %185 = arith.addf %181, %184 : vector<8x1xf32>
    %c36 = arith.constant 36 : index
    %186 = memref.load %arg2[%c36] : memref<50xf32, #tpu.memory_space<smem>>
    %187 = vector.broadcast %186 : f32 to vector<8x1xf32>
    %188 = arith.mulf %87, %187 : vector<8x1xf32>
    %189 = arith.addf %185, %188 : vector<8x1xf32>
    %c41 = arith.constant 41 : index
    %190 = memref.load %arg2[%c41] : memref<50xf32, #tpu.memory_space<smem>>
    %191 = vector.broadcast %190 : f32 to vector<8x1xf32>
    %192 = arith.mulf %99, %191 : vector<8x1xf32>
    %193 = arith.addf %189, %192 : vector<8x1xf32>
    %c46 = arith.constant 46 : index
    %194 = memref.load %arg2[%c46] : memref<50xf32, #tpu.memory_space<smem>>
    %195 = vector.broadcast %194 : f32 to vector<8x1xf32>
    %196 = arith.mulf %111, %195 : vector<8x1xf32>
    %197 = arith.addf %193, %196 : vector<8x1xf32>
    %cst_40 = arith.constant 0.000000e+00 : f32
    %198 = vector.broadcast %cst_40 : f32 to vector<8x1xf32>
    %199 = arith.maximumf %197, %198 : vector<8x1xf32>
    %c2 = arith.constant 2 : index
    %200 = memref.load %arg2[%c2] : memref<50xf32, #tpu.memory_space<smem>>
    %201 = vector.broadcast %200 : f32 to vector<8x1xf32>
    %202 = arith.mulf %3, %201 : vector<8x1xf32>
    %c2_41 = arith.constant 2 : index
    %203 = memref.load %arg3[%c2_41] : memref<5xf32, #tpu.memory_space<smem>>
    %204 = vector.broadcast %203 : f32 to vector<8x1xf32>
    %205 = arith.addf %202, %204 : vector<8x1xf32>
    %c7 = arith.constant 7 : index
    %206 = memref.load %arg2[%c7] : memref<50xf32, #tpu.memory_space<smem>>
    %207 = vector.broadcast %206 : f32 to vector<8x1xf32>
    %208 = arith.mulf %15, %207 : vector<8x1xf32>
    %209 = arith.addf %205, %208 : vector<8x1xf32>
    %c12 = arith.constant 12 : index
    %210 = memref.load %arg2[%c12] : memref<50xf32, #tpu.memory_space<smem>>
    %211 = vector.broadcast %210 : f32 to vector<8x1xf32>
    %212 = arith.mulf %27, %211 : vector<8x1xf32>
    %213 = arith.addf %209, %212 : vector<8x1xf32>
    %c17 = arith.constant 17 : index
    %214 = memref.load %arg2[%c17] : memref<50xf32, #tpu.memory_space<smem>>
    %215 = vector.broadcast %214 : f32 to vector<8x1xf32>
    %216 = arith.mulf %39, %215 : vector<8x1xf32>
    %217 = arith.addf %213, %216 : vector<8x1xf32>
    %c22 = arith.constant 22 : index
    %218 = memref.load %arg2[%c22] : memref<50xf32, #tpu.memory_space<smem>>
    %219 = vector.broadcast %218 : f32 to vector<8x1xf32>
    %220 = arith.mulf %51, %219 : vector<8x1xf32>
    %221 = arith.addf %217, %220 : vector<8x1xf32>
    %c27 = arith.constant 27 : index
    %222 = memref.load %arg2[%c27] : memref<50xf32, #tpu.memory_space<smem>>
    %223 = vector.broadcast %222 : f32 to vector<8x1xf32>
    %224 = arith.mulf %63, %223 : vector<8x1xf32>
    %225 = arith.addf %221, %224 : vector<8x1xf32>
    %c32 = arith.constant 32 : index
    %226 = memref.load %arg2[%c32] : memref<50xf32, #tpu.memory_space<smem>>
    %227 = vector.broadcast %226 : f32 to vector<8x1xf32>
    %228 = arith.mulf %75, %227 : vector<8x1xf32>
    %229 = arith.addf %225, %228 : vector<8x1xf32>
    %c37 = arith.constant 37 : index
    %230 = memref.load %arg2[%c37] : memref<50xf32, #tpu.memory_space<smem>>
    %231 = vector.broadcast %230 : f32 to vector<8x1xf32>
    %232 = arith.mulf %87, %231 : vector<8x1xf32>
    %233 = arith.addf %229, %232 : vector<8x1xf32>
    %c42 = arith.constant 42 : index
    %234 = memref.load %arg2[%c42] : memref<50xf32, #tpu.memory_space<smem>>
    %235 = vector.broadcast %234 : f32 to vector<8x1xf32>
    %236 = arith.mulf %99, %235 : vector<8x1xf32>
    %237 = arith.addf %233, %236 : vector<8x1xf32>
    %c47 = arith.constant 47 : index
    %238 = memref.load %arg2[%c47] : memref<50xf32, #tpu.memory_space<smem>>
    %239 = vector.broadcast %238 : f32 to vector<8x1xf32>
    %240 = arith.mulf %111, %239 : vector<8x1xf32>
    %241 = arith.addf %237, %240 : vector<8x1xf32>
    %cst_42 = arith.constant 0.000000e+00 : f32
    %242 = vector.broadcast %cst_42 : f32 to vector<8x1xf32>
    %243 = arith.maximumf %241, %242 : vector<8x1xf32>
    %c3 = arith.constant 3 : index
    %244 = memref.load %arg2[%c3] : memref<50xf32, #tpu.memory_space<smem>>
    %245 = vector.broadcast %244 : f32 to vector<8x1xf32>
    %246 = arith.mulf %3, %245 : vector<8x1xf32>
    %c3_43 = arith.constant 3 : index
    %247 = memref.load %arg3[%c3_43] : memref<5xf32, #tpu.memory_space<smem>>
    %248 = vector.broadcast %247 : f32 to vector<8x1xf32>
    %249 = arith.addf %246, %248 : vector<8x1xf32>
    %c8 = arith.constant 8 : index
    %250 = memref.load %arg2[%c8] : memref<50xf32, #tpu.memory_space<smem>>
    %251 = vector.broadcast %250 : f32 to vector<8x1xf32>
    %252 = arith.mulf %15, %251 : vector<8x1xf32>
    %253 = arith.addf %249, %252 : vector<8x1xf32>
    %c13 = arith.constant 13 : index
    %254 = memref.load %arg2[%c13] : memref<50xf32, #tpu.memory_space<smem>>
    %255 = vector.broadcast %254 : f32 to vector<8x1xf32>
    %256 = arith.mulf %27, %255 : vector<8x1xf32>
    %257 = arith.addf %253, %256 : vector<8x1xf32>
    %c18 = arith.constant 18 : index
    %258 = memref.load %arg2[%c18] : memref<50xf32, #tpu.memory_space<smem>>
    %259 = vector.broadcast %258 : f32 to vector<8x1xf32>
    %260 = arith.mulf %39, %259 : vector<8x1xf32>
    %261 = arith.addf %257, %260 : vector<8x1xf32>
    %c23 = arith.constant 23 : index
    %262 = memref.load %arg2[%c23] : memref<50xf32, #tpu.memory_space<smem>>
    %263 = vector.broadcast %262 : f32 to vector<8x1xf32>
    %264 = arith.mulf %51, %263 : vector<8x1xf32>
    %265 = arith.addf %261, %264 : vector<8x1xf32>
    %c28 = arith.constant 28 : index
    %266 = memref.load %arg2[%c28] : memref<50xf32, #tpu.memory_space<smem>>
    %267 = vector.broadcast %266 : f32 to vector<8x1xf32>
    %268 = arith.mulf %63, %267 : vector<8x1xf32>
    %269 = arith.addf %265, %268 : vector<8x1xf32>
    %c33 = arith.constant 33 : index
    %270 = memref.load %arg2[%c33] : memref<50xf32, #tpu.memory_space<smem>>
    %271 = vector.broadcast %270 : f32 to vector<8x1xf32>
    %272 = arith.mulf %75, %271 : vector<8x1xf32>
    %273 = arith.addf %269, %272 : vector<8x1xf32>
    %c38 = arith.constant 38 : index
    %274 = memref.load %arg2[%c38] : memref<50xf32, #tpu.memory_space<smem>>
    %275 = vector.broadcast %274 : f32 to vector<8x1xf32>
    %276 = arith.mulf %87, %275 : vector<8x1xf32>
    %277 = arith.addf %273, %276 : vector<8x1xf32>
    %c43 = arith.constant 43 : index
    %278 = memref.load %arg2[%c43] : memref<50xf32, #tpu.memory_space<smem>>
    %279 = vector.broadcast %278 : f32 to vector<8x1xf32>
    %280 = arith.mulf %99, %279 : vector<8x1xf32>
    %281 = arith.addf %277, %280 : vector<8x1xf32>
    %c48 = arith.constant 48 : index
    %282 = memref.load %arg2[%c48] : memref<50xf32, #tpu.memory_space<smem>>
    %283 = vector.broadcast %282 : f32 to vector<8x1xf32>
    %284 = arith.mulf %111, %283 : vector<8x1xf32>
    %285 = arith.addf %281, %284 : vector<8x1xf32>
    %cst_44 = arith.constant 0.000000e+00 : f32
    %286 = vector.broadcast %cst_44 : f32 to vector<8x1xf32>
    %287 = arith.maximumf %285, %286 : vector<8x1xf32>
    %c4 = arith.constant 4 : index
    %288 = memref.load %arg2[%c4] : memref<50xf32, #tpu.memory_space<smem>>
    %289 = vector.broadcast %288 : f32 to vector<8x1xf32>
    %290 = arith.mulf %3, %289 : vector<8x1xf32>
    %c4_45 = arith.constant 4 : index
    %291 = memref.load %arg3[%c4_45] : memref<5xf32, #tpu.memory_space<smem>>
    %292 = vector.broadcast %291 : f32 to vector<8x1xf32>
    %293 = arith.addf %290, %292 : vector<8x1xf32>
    %c9 = arith.constant 9 : index
    %294 = memref.load %arg2[%c9] : memref<50xf32, #tpu.memory_space<smem>>
    %295 = vector.broadcast %294 : f32 to vector<8x1xf32>
    %296 = arith.mulf %15, %295 : vector<8x1xf32>
    %297 = arith.addf %293, %296 : vector<8x1xf32>
    %c14 = arith.constant 14 : index
    %298 = memref.load %arg2[%c14] : memref<50xf32, #tpu.memory_space<smem>>
    %299 = vector.broadcast %298 : f32 to vector<8x1xf32>
    %300 = arith.mulf %27, %299 : vector<8x1xf32>
    %301 = arith.addf %297, %300 : vector<8x1xf32>
    %c19 = arith.constant 19 : index
    %302 = memref.load %arg2[%c19] : memref<50xf32, #tpu.memory_space<smem>>
    %303 = vector.broadcast %302 : f32 to vector<8x1xf32>
    %304 = arith.mulf %39, %303 : vector<8x1xf32>
    %305 = arith.addf %301, %304 : vector<8x1xf32>
    %c24 = arith.constant 24 : index
    %306 = memref.load %arg2[%c24] : memref<50xf32, #tpu.memory_space<smem>>
    %307 = vector.broadcast %306 : f32 to vector<8x1xf32>
    %308 = arith.mulf %51, %307 : vector<8x1xf32>
    %309 = arith.addf %305, %308 : vector<8x1xf32>
    %c29 = arith.constant 29 : index
    %310 = memref.load %arg2[%c29] : memref<50xf32, #tpu.memory_space<smem>>
    %311 = vector.broadcast %310 : f32 to vector<8x1xf32>
    %312 = arith.mulf %63, %311 : vector<8x1xf32>
    %313 = arith.addf %309, %312 : vector<8x1xf32>
    %c34 = arith.constant 34 : index
    %314 = memref.load %arg2[%c34] : memref<50xf32, #tpu.memory_space<smem>>
    %315 = vector.broadcast %314 : f32 to vector<8x1xf32>
    %316 = arith.mulf %75, %315 : vector<8x1xf32>
    %317 = arith.addf %313, %316 : vector<8x1xf32>
    %c39 = arith.constant 39 : index
    %318 = memref.load %arg2[%c39] : memref<50xf32, #tpu.memory_space<smem>>
    %319 = vector.broadcast %318 : f32 to vector<8x1xf32>
    %320 = arith.mulf %87, %319 : vector<8x1xf32>
    %321 = arith.addf %317, %320 : vector<8x1xf32>
    %c44 = arith.constant 44 : index
    %322 = memref.load %arg2[%c44] : memref<50xf32, #tpu.memory_space<smem>>
    %323 = vector.broadcast %322 : f32 to vector<8x1xf32>
    %324 = arith.mulf %99, %323 : vector<8x1xf32>
    %325 = arith.addf %321, %324 : vector<8x1xf32>
    %c49 = arith.constant 49 : index
    %326 = memref.load %arg2[%c49] : memref<50xf32, #tpu.memory_space<smem>>
    %327 = vector.broadcast %326 : f32 to vector<8x1xf32>
    %328 = arith.mulf %111, %327 : vector<8x1xf32>
    %329 = arith.addf %325, %328 : vector<8x1xf32>
    %cst_46 = arith.constant 0.000000e+00 : f32
    %330 = vector.broadcast %cst_46 : f32 to vector<8x1xf32>
    %331 = arith.maximumf %329, %330 : vector<8x1xf32>
    %c0_47 = arith.constant 0 : index
    %332 = memref.load %arg4[%c0_47] : memref<25xf32, #tpu.memory_space<smem>>
    %333 = vector.broadcast %332 : f32 to vector<8x1xf32>
    %334 = arith.mulf %155, %333 : vector<8x1xf32>
    %c0_48 = arith.constant 0 : index
    %335 = memref.load %arg5[%c0_48] : memref<5xf32, #tpu.memory_space<smem>>
    %336 = vector.broadcast %335 : f32 to vector<8x1xf32>
    %337 = arith.addf %334, %336 : vector<8x1xf32>
    %c5_49 = arith.constant 5 : index
    %338 = memref.load %arg4[%c5_49] : memref<25xf32, #tpu.memory_space<smem>>
    %339 = vector.broadcast %338 : f32 to vector<8x1xf32>
    %340 = arith.mulf %199, %339 : vector<8x1xf32>
    %341 = arith.addf %337, %340 : vector<8x1xf32>
    %c10_50 = arith.constant 10 : index
    %342 = memref.load %arg4[%c10_50] : memref<25xf32, #tpu.memory_space<smem>>
    %343 = vector.broadcast %342 : f32 to vector<8x1xf32>
    %344 = arith.mulf %243, %343 : vector<8x1xf32>
    %345 = arith.addf %341, %344 : vector<8x1xf32>
    %c15_51 = arith.constant 15 : index
    %346 = memref.load %arg4[%c15_51] : memref<25xf32, #tpu.memory_space<smem>>
    %347 = vector.broadcast %346 : f32 to vector<8x1xf32>
    %348 = arith.mulf %287, %347 : vector<8x1xf32>
    %349 = arith.addf %345, %348 : vector<8x1xf32>
    %c20_52 = arith.constant 20 : index
    %350 = memref.load %arg4[%c20_52] : memref<25xf32, #tpu.memory_space<smem>>
    %351 = vector.broadcast %350 : f32 to vector<8x1xf32>
    %352 = arith.mulf %331, %351 : vector<8x1xf32>
    %353 = arith.addf %349, %352 : vector<8x1xf32>
    %cst_53 = arith.constant 0.000000e+00 : f32
    %354 = vector.broadcast %cst_53 : f32 to vector<8x1xf32>
    %355 = arith.maximumf %353, %354 : vector<8x1xf32>
    %c1_54 = arith.constant 1 : index
    %356 = memref.load %arg4[%c1_54] : memref<25xf32, #tpu.memory_space<smem>>
    %357 = vector.broadcast %356 : f32 to vector<8x1xf32>
    %358 = arith.mulf %155, %357 : vector<8x1xf32>
    %c1_55 = arith.constant 1 : index
    %359 = memref.load %arg5[%c1_55] : memref<5xf32, #tpu.memory_space<smem>>
    %360 = vector.broadcast %359 : f32 to vector<8x1xf32>
    %361 = arith.addf %358, %360 : vector<8x1xf32>
    %c6_56 = arith.constant 6 : index
    %362 = memref.load %arg4[%c6_56] : memref<25xf32, #tpu.memory_space<smem>>
    %363 = vector.broadcast %362 : f32 to vector<8x1xf32>
    %364 = arith.mulf %199, %363 : vector<8x1xf32>
    %365 = arith.addf %361, %364 : vector<8x1xf32>
    %c11_57 = arith.constant 11 : index
    %366 = memref.load %arg4[%c11_57] : memref<25xf32, #tpu.memory_space<smem>>
    %367 = vector.broadcast %366 : f32 to vector<8x1xf32>
    %368 = arith.mulf %243, %367 : vector<8x1xf32>
    %369 = arith.addf %365, %368 : vector<8x1xf32>
    %c16_58 = arith.constant 16 : index
    %370 = memref.load %arg4[%c16_58] : memref<25xf32, #tpu.memory_space<smem>>
    %371 = vector.broadcast %370 : f32 to vector<8x1xf32>
    %372 = arith.mulf %287, %371 : vector<8x1xf32>
    %373 = arith.addf %369, %372 : vector<8x1xf32>
    %c21_59 = arith.constant 21 : index
    %374 = memref.load %arg4[%c21_59] : memref<25xf32, #tpu.memory_space<smem>>
    %375 = vector.broadcast %374 : f32 to vector<8x1xf32>
    %376 = arith.mulf %331, %375 : vector<8x1xf32>
    %377 = arith.addf %373, %376 : vector<8x1xf32>
    %cst_60 = arith.constant 0.000000e+00 : f32
    %378 = vector.broadcast %cst_60 : f32 to vector<8x1xf32>
    %379 = arith.maximumf %377, %378 : vector<8x1xf32>
    %c2_61 = arith.constant 2 : index
    %380 = memref.load %arg4[%c2_61] : memref<25xf32, #tpu.memory_space<smem>>
    %381 = vector.broadcast %380 : f32 to vector<8x1xf32>
    %382 = arith.mulf %155, %381 : vector<8x1xf32>
    %c2_62 = arith.constant 2 : index
    %383 = memref.load %arg5[%c2_62] : memref<5xf32, #tpu.memory_space<smem>>
    %384 = vector.broadcast %383 : f32 to vector<8x1xf32>
    %385 = arith.addf %382, %384 : vector<8x1xf32>
    %c7_63 = arith.constant 7 : index
    %386 = memref.load %arg4[%c7_63] : memref<25xf32, #tpu.memory_space<smem>>
    %387 = vector.broadcast %386 : f32 to vector<8x1xf32>
    %388 = arith.mulf %199, %387 : vector<8x1xf32>
    %389 = arith.addf %385, %388 : vector<8x1xf32>
    %c12_64 = arith.constant 12 : index
    %390 = memref.load %arg4[%c12_64] : memref<25xf32, #tpu.memory_space<smem>>
    %391 = vector.broadcast %390 : f32 to vector<8x1xf32>
    %392 = arith.mulf %243, %391 : vector<8x1xf32>
    %393 = arith.addf %389, %392 : vector<8x1xf32>
    %c17_65 = arith.constant 17 : index
    %394 = memref.load %arg4[%c17_65] : memref<25xf32, #tpu.memory_space<smem>>
    %395 = vector.broadcast %394 : f32 to vector<8x1xf32>
    %396 = arith.mulf %287, %395 : vector<8x1xf32>
    %397 = arith.addf %393, %396 : vector<8x1xf32>
    %c22_66 = arith.constant 22 : index
    %398 = memref.load %arg4[%c22_66] : memref<25xf32, #tpu.memory_space<smem>>
    %399 = vector.broadcast %398 : f32 to vector<8x1xf32>
    %400 = arith.mulf %331, %399 : vector<8x1xf32>
    %401 = arith.addf %397, %400 : vector<8x1xf32>
    %cst_67 = arith.constant 0.000000e+00 : f32
    %402 = vector.broadcast %cst_67 : f32 to vector<8x1xf32>
    %403 = arith.maximumf %401, %402 : vector<8x1xf32>
    %c3_68 = arith.constant 3 : index
    %404 = memref.load %arg4[%c3_68] : memref<25xf32, #tpu.memory_space<smem>>
    %405 = vector.broadcast %404 : f32 to vector<8x1xf32>
    %406 = arith.mulf %155, %405 : vector<8x1xf32>
    %c3_69 = arith.constant 3 : index
    %407 = memref.load %arg5[%c3_69] : memref<5xf32, #tpu.memory_space<smem>>
    %408 = vector.broadcast %407 : f32 to vector<8x1xf32>
    %409 = arith.addf %406, %408 : vector<8x1xf32>
    %c8_70 = arith.constant 8 : index
    %410 = memref.load %arg4[%c8_70] : memref<25xf32, #tpu.memory_space<smem>>
    %411 = vector.broadcast %410 : f32 to vector<8x1xf32>
    %412 = arith.mulf %199, %411 : vector<8x1xf32>
    %413 = arith.addf %409, %412 : vector<8x1xf32>
    %c13_71 = arith.constant 13 : index
    %414 = memref.load %arg4[%c13_71] : memref<25xf32, #tpu.memory_space<smem>>
    %415 = vector.broadcast %414 : f32 to vector<8x1xf32>
    %416 = arith.mulf %243, %415 : vector<8x1xf32>
    %417 = arith.addf %413, %416 : vector<8x1xf32>
    %c18_72 = arith.constant 18 : index
    %418 = memref.load %arg4[%c18_72] : memref<25xf32, #tpu.memory_space<smem>>
    %419 = vector.broadcast %418 : f32 to vector<8x1xf32>
    %420 = arith.mulf %287, %419 : vector<8x1xf32>
    %421 = arith.addf %417, %420 : vector<8x1xf32>
    %c23_73 = arith.constant 23 : index
    %422 = memref.load %arg4[%c23_73] : memref<25xf32, #tpu.memory_space<smem>>
    %423 = vector.broadcast %422 : f32 to vector<8x1xf32>
    %424 = arith.mulf %331, %423 : vector<8x1xf32>
    %425 = arith.addf %421, %424 : vector<8x1xf32>
    %cst_74 = arith.constant 0.000000e+00 : f32
    %426 = vector.broadcast %cst_74 : f32 to vector<8x1xf32>
    %427 = arith.maximumf %425, %426 : vector<8x1xf32>
    %c4_75 = arith.constant 4 : index
    %428 = memref.load %arg4[%c4_75] : memref<25xf32, #tpu.memory_space<smem>>
    %429 = vector.broadcast %428 : f32 to vector<8x1xf32>
    %430 = arith.mulf %155, %429 : vector<8x1xf32>
    %c4_76 = arith.constant 4 : index
    %431 = memref.load %arg5[%c4_76] : memref<5xf32, #tpu.memory_space<smem>>
    %432 = vector.broadcast %431 : f32 to vector<8x1xf32>
    %433 = arith.addf %430, %432 : vector<8x1xf32>
    %c9_77 = arith.constant 9 : index
    %434 = memref.load %arg4[%c9_77] : memref<25xf32, #tpu.memory_space<smem>>
    %435 = vector.broadcast %434 : f32 to vector<8x1xf32>
    %436 = arith.mulf %199, %435 : vector<8x1xf32>
    %437 = arith.addf %433, %436 : vector<8x1xf32>
    %c14_78 = arith.constant 14 : index
    %438 = memref.load %arg4[%c14_78] : memref<25xf32, #tpu.memory_space<smem>>
    %439 = vector.broadcast %438 : f32 to vector<8x1xf32>
    %440 = arith.mulf %243, %439 : vector<8x1xf32>
    %441 = arith.addf %437, %440 : vector<8x1xf32>
    %c19_79 = arith.constant 19 : index
    %442 = memref.load %arg4[%c19_79] : memref<25xf32, #tpu.memory_space<smem>>
    %443 = vector.broadcast %442 : f32 to vector<8x1xf32>
    %444 = arith.mulf %287, %443 : vector<8x1xf32>
    %445 = arith.addf %441, %444 : vector<8x1xf32>
    %c24_80 = arith.constant 24 : index
    %446 = memref.load %arg4[%c24_80] : memref<25xf32, #tpu.memory_space<smem>>
    %447 = vector.broadcast %446 : f32 to vector<8x1xf32>
    %448 = arith.mulf %331, %447 : vector<8x1xf32>
    %449 = arith.addf %445, %448 : vector<8x1xf32>
    %cst_81 = arith.constant 0.000000e+00 : f32
    %450 = vector.broadcast %cst_81 : f32 to vector<8x1xf32>
    %451 = arith.maximumf %449, %450 : vector<8x1xf32>
    %c0_82 = arith.constant 0 : index
    %452 = memref.load %arg6[%c0_82] : memref<5xf32, #tpu.memory_space<smem>>
    %453 = vector.broadcast %452 : f32 to vector<8x1xf32>
    %454 = arith.mulf %355, %453 : vector<8x1xf32>
    %c0_83 = arith.constant 0 : index
    %455 = memref.load %arg7[%c0_83] : memref<1xf32, #tpu.memory_space<smem>>
    %456 = vector.broadcast %455 : f32 to vector<8x1xf32>
    %457 = arith.addf %454, %456 : vector<8x1xf32>
    %c1_84 = arith.constant 1 : index
    %458 = memref.load %arg6[%c1_84] : memref<5xf32, #tpu.memory_space<smem>>
    %459 = vector.broadcast %458 : f32 to vector<8x1xf32>
    %460 = arith.mulf %379, %459 : vector<8x1xf32>
    %461 = arith.addf %457, %460 : vector<8x1xf32>
    %c2_85 = arith.constant 2 : index
    %462 = memref.load %arg6[%c2_85] : memref<5xf32, #tpu.memory_space<smem>>
    %463 = vector.broadcast %462 : f32 to vector<8x1xf32>
    %464 = arith.mulf %403, %463 : vector<8x1xf32>
    %465 = arith.addf %461, %464 : vector<8x1xf32>
    %c3_86 = arith.constant 3 : index
    %466 = memref.load %arg6[%c3_86] : memref<5xf32, #tpu.memory_space<smem>>
    %467 = vector.broadcast %466 : f32 to vector<8x1xf32>
    %468 = arith.mulf %427, %467 : vector<8x1xf32>
    %469 = arith.addf %465, %468 : vector<8x1xf32>
    %c4_87 = arith.constant 4 : index
    %470 = memref.load %arg6[%c4_87] : memref<5xf32, #tpu.memory_space<smem>>
    %471 = vector.broadcast %470 : f32 to vector<8x1xf32>
    %472 = arith.mulf %451, %471 : vector<8x1xf32>
    %473 = arith.addf %469, %472 : vector<8x1xf32>
    %474 = math.absf %473 : vector<8x1xf32>
    %cst_88 = arith.constant 9.99999996E-13 : f32
    %cst_89 = arith.constant 9.99999995E+11 : f32
    %475 = vector.broadcast %cst_88 : f32 to vector<8x1xf32>
    %476 = arith.maximumf %475, %474 : vector<8x1xf32>
    %477 = vector.broadcast %cst_89 : f32 to vector<8x1xf32>
    %478 = arith.minimumf %477, %476 : vector<8x1xf32>
    %479 = tpu.reciprocal %478 : vector<8x1xf32> -> vector<8x1xf32>
    %480 = vector.broadcast %3 : vector<8x1xf32> to vector<8x128xf32>
    %481 = arith.subf %0, %480 : vector<8x128xf32>
    %482 = vector.broadcast %479 : vector<8x1xf32> to vector<8x128xf32>
    %483 = arith.mulf %481, %482 : vector<8x128xf32>
    %484 = math.exp %483 : vector<8x128xf32>
    %cst_90 = arith.constant dense<0.000000e+00> : vector<8xf32>
    %485 = vector.multi_reduction <add>, %484, %cst_90 [1] : vector<8x128xf32> to vector<8xf32>
    %486 = vector.shape_cast %485 : vector<8xf32> to vector<8x1xf32>
    %487 = tpu.reciprocal %486 : vector<8x1xf32> -> vector<8x1xf32>
    %488 = vector.broadcast %487 : vector<8x1xf32> to vector<8x128xf32>
    %489 = arith.mulf %484, %488 : vector<8x128xf32>
    %c0_91 = arith.constant 0 : index
    %c0_92 = arith.constant 0 : index
    %490 = vector.load %arg8[%c0_91, %c0_92] : memref<8x128xf32, #tpu.memory_space<vmem>>, vector<8x128xf32>
    tpu.vector_store %arg8[%c0_91, %c0_92], %489 {strides = array<i32>} : memref<8x128xf32, #tpu.memory_space<vmem>>, vector<8x128xf32>,
    return
  }
  func.func @transform_0(%arg0: i32) -> (i32, i32) {
    %c0_i32 = arith.constant 0 : i32
    %c0_i32_0 = arith.constant 0 : i32
    return %arg0, %c0_i32 : i32, i32
  }
  func.func @transform_1(%arg0: i32) -> i32 {
    %c0_i32 = arith.constant 0 : i32
    %c0_i32_0 = arith.constant 0 : i32
    return %c0_i32 : i32
  }
  func.func @transform_2(%arg0: i32) -> i32 {
    %c0_i32 = arith.constant 0 : i32
    %c0_i32_0 = arith.constant 0 : i32
    return %c0_i32 : i32
  }
  func.func @transform_3(%arg0: i32) -> i32 {
    %c0_i32 = arith.constant 0 : i32
    %c0_i32_0 = arith.constant 0 : i32
    return %c0_i32 : i32
  }
  func.func @transform_4(%arg0: i32) -> i32 {
    %c0_i32 = arith.constant 0 : i32
    %c0_i32_0 = arith.constant 0 : i32
    return %c0_i32 : i32
  }
  func.func @transform_5(%arg0: i32) -> i32 {
    %c0_i32 = arith.constant 0 : i32
    %c0_i32_0 = arith.constant 0 : i32
    return %c0_i32 : i32
  }
  func.func @transform_6(%arg0: i32) -> i32 {
    %c0_i32 = arith.constant 0 : i32
    %c0_i32_0 = arith.constant 0 : i32
    return %c0_i32 : i32
  }
  func.func @transform_7(%arg0: i32) -> (i32, i32) {
    %c0_i32 = arith.constant 0 : i32
    %c0_i32_0 = arith.constant 0 : i32
    return %arg0, %c0_i32 : i32, i32
  }
}

</mosaic_0001>

<bundles_post_ra>
// kernel: _lambda_.1
= control target key start
LH: loop header
LB: loop body
LE: loop exit
PB: predicated region body
PF: predicated region fallthrough
CT: control target
= control target key end

     0   :  { %s1957_s0 = inlined_call_operand.vmem [shape: f32[16,128], index: 0, kind: input, shape index: {}]   ;;  %s1958_s1 = inlined_call_operand.vmem [shape: f32[50], index: 1, kind: input, shape index: {}]   ;;  %s1959_s2 = inlined_call_operand.vmem [shape: f32[5], index: 2, kind: input, shape index: {}]   ;;  %s1960_s3 = inlined_call_operand.vmem [shape: f32[25], index: 3, kind: input, shape index: {}]   ;;  %s1961_s4 = inlined_call_operand.vmem [shape: f32[5], index: 4, kind: input, shape index: {}]   ;;  %s1962_s5 = inlined_call_operand.vmem [shape: f32[5], index: 5, kind: input, shape index: {}]   ;;  %s1963_s6 = inlined_call_operand.<no memory space> [shape: f32[1], index: 6, kind: input, shape index: {}]   ;;  %s1964_s7 = inlined_call_operand.hbm [shape: f32[16,128], index: 7, kind: output, shape index: {}]  }
   0x1   :  { %1977 = sst [smem:[#allocation24_spill]] %s1957_s0 }
   0x2   :  { %1978 = sst [smem:[#allocation25_spill]] %s1958_s1 }
   0x3   :  { %1979 = sst [smem:[#allocation26_spill]] %s1959_s2 }
   0x4   :  { %1980 = sst [smem:[#allocation27_spill]] %s1960_s3 }
   0x5   :  { %1981 = sst [smem:[#allocation28_spill]] %s1961_s4 }
   0x6   :  { %1982 = sst [smem:[#allocation29_spill]] %s1962_s5 }
   0x7   :  { %1983 = sst [smem:[#allocation30_spill]] %s1964_s7 }
   0x8   :  { %12 = sst [smem:[#allocation2]] %s1963_s6 }
   0x9   :  { %13 = vsyncpa [#allocation5], 0 }
   0xa   :  { %14 = vsyncpa [#allocation7], 0 }
   0xb   :  { %15 = vsyncpa [#allocation10], 0 }
   0xc   :  { %16 = vsyncpa [#allocation4], 0 }
   0xd   :  { %18 = vsyncpa [#allocation4 + $0x1], 0  ;;  %s1414_s26 = smov 0   ;;  %s1416_s27 = smov 0  }
   0xe   :  { %s1418_s28 = smov 0   ;;  %s1420_s29 = smov 0  }
   0xf LB: > { %1984 = sst [smem:[#allocation17_spill]] %s1351_s26  ;;  %s1435_s6 = sadd.s32 4294967295, %s1363_s29   ;;  %s1363_s29 = sphi %s1420_s29, %s2016_s29   ;;  %s1359_s28 = sphi %s1418_s28, %s2021_s28   ;;  %s1355_s27 = sphi %s1416_s27, %s2020_s27   ;;  %s1351_s26 = sphi %s1414_s26, %s2019_s26  }
  0x10   : > { %1985 = sst [smem:[#allocation18_spill]] %s1359_s28  ;;  %s1012_s30 = sadd.s32 4294967294, %s1363_s29  }
  0x11   : > { %1986 = sst [smem:[#allocation19_spill]] %s1363_s29  ;;  %s1439_s8 = sadd.s32 1, %s1363_s29  }
  0x12   : > { %1987 = sst [smem:[#allocation20_spill]] %s1439_s8  ;;  %s183_s9 = sadd.s32 1, %s1359_s28 }
  0x13   : > { %s180_s10 = ssub.s32 %s1363_s29, %s1439_s8  ;;  %p193_p0 = scmp.ne.s32.totalorder %s1359_s28, %s1355_s27 }
  0x14   : > { %p181_p1 = scmp.eq.s32.totalorder %s180_s10, 0  ;;  %p194_p2 = scmp.eq.s32.totalorder %s1435_s6, 1 }
  0x15   : > { %p199_p3 = scmp.ne.s32.totalorder %s1355_s27, %s1351_s26  ;;  %p200_p4 = scmp.eq.s32.totalorder %s1012_s30, 1 }
  0x16   : > { %s1450_s11 = scalar_select %p181_p1, %s1359_s28, %s183_s9  }
  0x17   : > { %p1452_p5 = por %p194_p2, %p193_p0  ;;  %p1456_p6 = por %p200_p4, %p199_p3 }
  0x18   : > { %1988 = sst [smem:[#allocation21_spill]] %s1450_s11  ;;  %p1013_p7 = scmp.ge.s32.totalorder %s1363_s29, 1 }
  0x19   : > { %s1989_s12 = scalar_select %p1452_p5, 1, 0 }
  0x1a   : > { %s1991_s13 = scalar_select %p1456_p6, 1, 0 }
  0x1b   : > { %1990 = sst [smem:[#allocation22_spill]] %s1989_s12  ;;  %p207_p8 = scmp.lt.s32.totalorder %s1363_s29, 3 }
  0x1c   : > { %1992 = sst [smem:[#allocation23_spill]] %s1991_s13  ;;  %p1965_p9 = scmp.eq.s32.totalorder %s1435_s6, 0 }
  0x1d   : > { %p1463_p10 = pnand %p1013_p7, %p207_p8  ;;  %s1994_s2 = sld [smem:[#allocation26_spill]] }
  0x1e   : > { %s1995_s4 = sld [smem:[#allocation28_spill]]  ;;  %s1997_s1 = sld [smem:[#allocation25_spill]] }
  0x1f   : > { %s1993_s14 = scalar_select %p1463_p10, 1, 0 }
  0x20   : > { %p1139_p11 = pneg %p1463_p10  ;;  %s1998_s3 = sld [smem:[#allocation27_spill]] }
  0x22   : > { %p1477_p12 = pnand %p1965_p9, %p1139_p11 }
  0x23   : > { %s231_s17 = sshll.u32 %s1994_s2, 4  ;;  %s232_s17 = int_to_ptr.vmem [resolvable:$true] %s231_s17 }
  0x24   : > { %s253_s20 = sshll.u32 %s1995_s4, 4  ;;  %s220_s24 = sshll.u32 %s1997_s1, 4  ;;  %s254_s20 = int_to_ptr.vmem [resolvable:$true] %s253_s20  ;;  %s1484_s24 = int_to_ptr.vmem [resolvable:$true] %s220_s24 }
  0x25   : > { %s1214_s10 = scalar_lea.vmem %s232_s17, 16  ;;  %p1491_p0 = pneg %p1477_p12 }
  0x26   : > { %s242_s9 = sshll.u32 %s1998_s3, 4  ;;  %p1215_p13 = scmp.ne.s32.totalorder %s232_s17, %s1214_s10  ;;  %s243_s9 = int_to_ptr.vmem [resolvable:$true] %s242_s9 }
  0x27   : > { %p1222_p3 = scmp.lt.s32.totalorder %s232_s17, %s232_s17  ;;  %p1223_p4 = scmp.lt.s32.totalorder %s1214_s10, %s1214_s10 }
  0x28   : > { %p1217_p1 = pnand %p1491_p0, %p1215_p13 }
  0x29   : > { %p1224_p7 = por %p1223_p4, %p1222_p3 }
  0x2a   : > { %p1218_p2 = pneg %p1217_p1 }
  0x2c   : > { %p1225_p8 = pnand %p1224_p7, %p1218_p2 }
  0x2e   : > { %1228 = shalt.err (!%p1225_p8)
}
  0x2f   : > { %s1365_s16 = smov [#allocation6]   ;;  %s1229_s18 = scalar_lea.vmem %s254_s20, 16 }
  0x30   : > { %1145 = dma.vmem_to_smem (!%p1477_p12), %s232_s17, 16, %s1365_s16, [#allocation7]  }
  0x31   : > { %p1230_p11 = scmp.ne.s32.totalorder %s254_s20, %s1229_s18  ;;  %p1237_p5 = scmp.lt.s32.totalorder %s254_s20, %s254_s20 }
  0x32   : > { %p1238_p10 = scmp.lt.s32.totalorder %s1229_s18, %s1229_s18 }
  0x33   : > { %p1232_p9 = pnand %p1230_p11, %p1491_p0 }
  0x34   : > { %p1239_p13 = por %p1238_p10, %p1237_p5 }
  0x35   : > { %p1233_p6 = pneg %p1232_p9 }
  0x37   : > { %p1240_p1 = pnand %p1239_p13, %p1233_p6 }
  0x39   : > { %1243 = shalt.err (!%p1240_p1)
}
  0x3a   : > { %s1366_s19 = smov [#allocation9]   ;;  %s1244_s22 = scalar_lea.vmem %s1484_s24, 16 }
  0x3b   : > { %1151 = dma.vmem_to_smem (!%p1477_p12), %s254_s20, 16, %s1366_s19, [#allocation10]  }
  0x3c   : > { %p1245_p2 = scmp.ne.s32.totalorder %s1484_s24, %s1244_s22  ;;  %p1252_p9 = scmp.lt.s32.totalorder %s1484_s24, %s1484_s24 }
  0x3d   : > { %p1253_p7 = scmp.lt.s32.totalorder %s1244_s22, %s1244_s22 }
  0x3e   : > { %p1247_p3 = pnand %p1245_p2, %p1491_p0 }
  0x3f   : > { %p1254_p8 = por %p1253_p7, %p1252_p9 }
  0x40   : > { %p1248_p4 = pneg %p1247_p3 }
  0x42   : > { %p1255_p5 = pnand %p1254_p8, %p1248_p4 }
  0x44   : > { %1258 = shalt.err (!%p1255_p5)
}
  0x45   : > { %s1367_s17 = smov [#allocation3]   ;;  %s1259_s20 = scalar_lea.vmem %s243_s9, 16 }
  0x46   : > { %1142 = dma.vmem_to_smem (!%p1477_p12), %s1484_s24, 16, %s1367_s17, [#allocation5]  }
  0x47   : > { %p1260_p6 = scmp.ne.s32.totalorder %s243_s9, %s1259_s20  ;;  %p1267_p13 = scmp.lt.s32.totalorder %s243_s9, %s243_s9 }
  0x48   : > { %p1268_p1 = scmp.lt.s32.totalorder %s1259_s20, %s1259_s20 }
  0x49   : > { %p1262_p10 = pnand %p1260_p6, %p1491_p0 }
  0x4a   : > { %p1269_p2 = por %p1268_p1, %p1267_p13 }
  0x4b   : > { %p1263_p11 = pneg %p1262_p10 }
  0x4d   : > { %p1270_p3 = pnand %p1269_p2, %p1263_p11 }
  0x4f   : > { %1273 = shalt.err (!%p1270_p3)
}
  0x50   : > { %s1368_s30 = smov [#allocation8]   ;;  %s2000_s5 = sld [smem:[#allocation29_spill]] }
  0x51   : > { %1148 = dma.vmem_to_smem (!%p1477_p12), %s243_s9, 16, %s1368_s30, [#allocation7]  }
  0x56   : > { %s264_s16 = sshll.u32 %s2000_s5, 4  ;;  %s265_s16 = int_to_ptr.vmem [resolvable:$true] %s264_s16 }
  0x57   : > { %s1274_s18 = scalar_lea.vmem %s265_s16, 16  ;;  %p1282_p8 = scmp.lt.s32.totalorder %s265_s16, %s265_s16 }
  0x58   : > { %p1275_p4 = scmp.ne.s32.totalorder %s265_s16, %s1274_s18  ;;  %p1283_p5 = scmp.lt.s32.totalorder %s1274_s18, %s1274_s18 }
  0x5a   : > { %p1277_p9 = pnand %p1275_p4, %p1491_p0  ;;  %p1284_p6 = por %p1283_p5, %p1282_p8 }
  0x5c   : > { %p1278_p7 = pneg %p1277_p9 }
  0x5e   : > { %p1285_p10 = pnand %p1284_p6, %p1278_p7 }
  0x60   : > { %1288 = shalt.err (!%p1285_p10)
}
  0x61   : > { %s1369_s19 = smov [#allocation11]   ;;  %p2001_p11 = scmp.ne.s32.totalorder %s1993_s14, 0 }
  0x62   : > { %1154 = dma.vmem_to_smem (!%p1477_p12), %s265_s16, 16, %s1369_s19, [#allocation10]  }
  0x63   : > { %287 = sbr.rel (%p2001_p11) target bundleno = 4460 (0x116c), region = 48  ;;  %p2002_p13 = scmp.eq.s32.totalorder (!%p2001_p11), %s1435_s6, 0 }
  0x6a   : > { %1334 = dma.done.wait (%p2002_p13), [#allocation5], 16   ;;  %p2003_p1 = pmov %p2002_p13 }
  0x6c   : > { %1336 = vsyncadd (%p2003_p1), [#allocation5], 4294967280  ;;  %p2004_p0 = pmov %p2003_p1 }
  0x6e   : > { %1338 = dma.done.wait (%p2004_p0), [#allocation7], 32   ;;  %p2005_p2 = pmov %p2004_p0 }
  0x6f   : > { %p2006_p3 = pmov %p2004_p0 }
  0x70   : > { %1340 = vsyncadd (%p2005_p2), [#allocation7], 4294967264 }
  0x71   : > { %1342 = dma.done.wait (%p2006_p3), [#allocation10], 32   ;;  %p2007_p12 = pmov %p2004_p0 }
  0x73   : > { %1344 = vsyncadd (%p2007_p12), [#allocation10], 4294967264 }
  0x74   : > { %309 = sfence }
  0x75   : > { %p335_p4 = scmp.lt.s32.totalorder %s1435_s6, 1  ;;  %s2008_s0 = sld [smem:[#allocation24_spill]]  ;;  %v340_v1 = vlaneseq }
  0x76   : > { %s524_s17 = sld [smem:[#allocation3]]  ;;  %s1587_s23 = sld [smem:[#allocation3 + $0x1]] }
  0x77   : > { %s336_s14 = scalar_select %p335_p4, %s1435_s6, 1  ;;  %v1549_v2 = vand.u32 127, %v340_v1 }
  0x78   : > { %s1589_s25 = sld [smem:[#allocation3 + $0x2]]  ;;  %s1591_s20 = sld [smem:[#allocation3 + $0x3]] }
  0x79   : > { %s1027_s21 = sshll.u32 %s336_s14, 3  ;;  %s1593_s30 = sld [smem:[#allocation3 + $0x4]] }
  0x7a   : > { %s1595_s24 = sld [smem:[#allocation6]]  ;;  %s1597_s10 = sld [smem:[#allocation6 + $0x1]] }
  0x7b   : > { %s1546_s22 = scalar_lea.vmem %s2008_s0, %s1027_s21  ;;  %s1599_s16 = sld [smem:[#allocation6 + $0x2]] }
  0x7c   : > { %v339_v0 = vld [vmem:[%s1546_s22] sm:$0xff]  ;;  %s1601_s18 = sld [smem:[#allocation6 + $0x3]]  ;;  %s1603_s19 = sld [smem:[#allocation6 + $0x4]] }
  0x7d   : > { %342 = vmax.xlane.f32.xlu0 %v339_v0  ;;  %s1605_s14 = sld [smem:[#allocation3 + $0x5]]  ;;  %s1607_s21 = sld [smem:[#allocation3 + $0x6]] }
  0x7e   : > { %s1609_s9 = sld [smem:[#allocation3 + $0x7]]  ;;  %s1611_s15 = sld [smem:[#allocation3 + $0x8]] }
  0x7f   : > { %s1613_s0 = sld [smem:[#allocation3 + $0x9]]  ;;  %s1615_s1 = sld [smem:[#allocation3 + $0xa]] }
  0x80   : > { %s1617_s2 = sld [smem:[#allocation3 + $0xb]]  ;;  %s1619_s3 = sld [smem:[#allocation3 + $0xc]] }
  0x81   : > { %s1621_s4 = sld [smem:[#allocation3 + $0xd]]  ;;  %s1623_s5 = sld [smem:[#allocation3 + $0xe]] }
  0x82   : > { %s1819_s11 = sld [smem:[#allocation8 + $0xc]]  ;;  %s1821_s28 = sld [smem:[#allocation8 + $0x11]] }
  0x83   : > { %s1823_s8 = sld [smem:[#allocation8 + $0x16]]  ;;  %s1825_s13 = sld [smem:[#allocation8 + $0x3]] }
  0x84   : > { %s1828_s26 = sld [smem:[#allocation9 + $0x3]]  ;;  %s1830_s29 = sld [smem:[#allocation8 + $0x8]] }
  0x85   : > { %s1836_s7 = sld [smem:[#allocation8 + $0xd]]  ;;  %s1844_s12 = sld [smem:[#allocation8 + $0x17]] }
 0x10a   : > { %v1551_v3 = vpop.xlane.xlu0 %342 }
 0x10b   : > { %vm344_vm0 = vcmp.eq.f32.partialorder %v339_v0, %v1551_v3 }
 0x10c   : > { %v345_v4 = vsel %vm344_vm0, %v1549_v2, 128 }
 0x10d   : > { %v347_v5 = vshra.s32 %v345_v4, 16  ;;  %v346_v7 = vand.u32 65535, %v345_v4 }
 0x10f   : > { %v349_v6 = vcvt.s32.f32 %v347_v5  ;;  %v348_v9 = vcvt.s32.f32 %v346_v7 }
 0x111   : > { %350 = vmin.xlane.f32.xlu0 %v349_v6 }
 0x19e   : > { %v351_v8 = vpop.xlane.xlu0 %350 }
 0x19f   : > { %vm352_vm1 = vcmp.eq.f32.partialorder %v349_v6, %v351_v8  ;;  %v357_v11 = vcvt.f32.s32 %v351_v8 }
 0x1a0   : > { %v353_v10 = vsel %vm352_vm1, %v348_v9, inf }
 0x1a1   : > { %354 = vmin.xlane.f32.xlu1 %v353_v10  ;;  %v358_v13 = vshll.u32 %v357_v11, 16 }
 0x22e   : > { %v355_v12 = vpop.xlane.xlu1 %354 }
 0x22f   : > { %v356_v14 = vcvt.f32.s32 %v355_v12 }
 0x231   : > { %v359_v15 = vadd.s32 %v358_v13, %v356_v14 }
 0x233   : > { %vm360_vm2 = vcmp.eq.s32.totalorder %v345_v4, %v359_v15 }
 0x234   : > { %v361_v16 = vsel %vm360_vm2, -inf, %v339_v0 }
 0x235   : > { %362 = vmax.xlane.f32.xlu1 %v361_v16 }
 0x2c2   : > { %v1555_v17 = vpop.xlane.xlu1 %362 }
 0x2c3   : > { %vm364_vm3 = vcmp.eq.f32.partialorder %v361_v16, %v1555_v17 }
 0x2c4   : > { %v365_v18 = vsel %vm364_vm3, %v1549_v2, 128 }
 0x2c5   : > { %v367_v19 = vshra.s32 %v365_v18, 16  ;;  %v366_v21 = vand.u32 65535, %v365_v18 }
 0x2c7   : > { %v369_v20 = vcvt.s32.f32 %v367_v19  ;;  %v368_v23 = vcvt.s32.f32 %v366_v21 }
 0x2c9   : > { %370 = vmin.xlane.f32.xlu0 %v369_v20 }
 0x356   : > { %v371_v22 = vpop.xlane.xlu0 %370 }
 0x357   : > { %vm372_vm4 = vcmp.eq.f32.partialorder %v369_v20, %v371_v22  ;;  %v377_v25 = vcvt.f32.s32 %v371_v22 }
 0x358   : > { %v373_v24 = vsel %vm372_vm4, %v368_v23, inf }
 0x359   : > { %374 = vmin.xlane.f32.xlu1 %v373_v24  ;;  %v378_v27 = vshll.u32 %v377_v25, 16 }
 0x3e6   : > { %v375_v26 = vpop.xlane.xlu1 %374 }
 0x3e7   : > { %v376_v28 = vcvt.f32.s32 %v375_v26 }
 0x3e9   : > { %v379_v29 = vadd.s32 %v378_v27, %v376_v28 }
 0x3eb   : > { %vm380_vm5 = vcmp.eq.s32.totalorder %v365_v18, %v379_v29 }
 0x3ec   : > { %v381_v30 = vsel %vm380_vm5, -inf, %v361_v16 }
 0x3ed   : > { %382 = vmax.xlane.f32.xlu0 %v381_v30 }
 0x47a   : > { %v1559_v31 = vpop.xlane.xlu0 %382 }
 0x47b   : > { %vm384_vm6 = vcmp.eq.f32.partialorder %v381_v30, %v1559_v31 }
 0x47c   : > { %v385_v32 = vsel %vm384_vm6, %v1549_v2, 128 }
 0x47d   : > { %v387_v33 = vshra.s32 %v385_v32, 16  ;;  %v386_v35 = vand.u32 65535, %v385_v32 }
 0x47f   : > { %v389_v34 = vcvt.s32.f32 %v387_v33  ;;  %v388_v37 = vcvt.s32.f32 %v386_v35 }
 0x481   : > { %390 = vmin.xlane.f32.xlu1 %v389_v34 }
 0x50e   : > { %v391_v36 = vpop.xlane.xlu1 %390 }
 0x50f   : > { %vm392_vm7 = vcmp.eq.f32.partialorder %v389_v34, %v391_v36  ;;  %v397_v39 = vcvt.f32.s32 %v391_v36 }
 0x510   : > { %v393_v38 = vsel %vm392_vm7, %v388_v37, inf }
 0x511   : > { %394 = vmin.xlane.f32.xlu0 %v393_v38  ;;  %v398_v41 = vshll.u32 %v397_v39, 16 }
 0x59e   : > { %v395_v40 = vpop.xlane.xlu0 %394 }
 0x59f   : > { %v396_v42 = vcvt.f32.s32 %v395_v40 }
 0x5a1   : > { %v399_v43 = vadd.s32 %v398_v41, %v396_v42 }
 0x5a3   : > { %vm400_vm8 = vcmp.eq.s32.totalorder %v385_v32, %v399_v43 }
 0x5a4   : > { %v401_v44 = vsel %vm400_vm8, -inf, %v381_v30 }
 0x5a5   : > { %402 = vmax.xlane.f32.xlu1 %v401_v44 }
 0x632   : > { %v1563_v45 = vpop.xlane.xlu1 %402 }
 0x633   : > { %vm404_vm9 = vcmp.eq.f32.partialorder %v401_v44, %v1563_v45 }
 0x634   : > { %v405_v46 = vsel %vm404_vm9, %v1549_v2, 128 }
 0x635   : > { %v407_v47 = vshra.s32 %v405_v46, 16  ;;  %v406_v49 = vand.u32 65535, %v405_v46 }
 0x637   : > { %v409_v48 = vcvt.s32.f32 %v407_v47  ;;  %v408_v51 = vcvt.s32.f32 %v406_v49 }
 0x639   : > { %410 = vmin.xlane.f32.xlu0 %v409_v48 }
 0x6c6   : > { %v411_v50 = vpop.xlane.xlu0 %410 }
 0x6c7   : > { %vm412_vm10 = vcmp.eq.f32.partialorder %v409_v48, %v411_v50  ;;  %v417_v53 = vcvt.f32.s32 %v411_v50 }
 0x6c8   : > { %v413_v52 = vsel %vm412_vm10, %v408_v51, inf }
 0x6c9   : > { %414 = vmin.xlane.f32.xlu1 %v413_v52  ;;  %v418_v55 = vshll.u32 %v417_v53, 16 }
 0x756   : > { %v415_v54 = vpop.xlane.xlu1 %414 }
 0x757   : > { %v416_v56 = vcvt.f32.s32 %v415_v54 }
 0x759   : > { %v419_v57 = vadd.s32 %v418_v55, %v416_v56 }
 0x75b   : > { %vm420_vm11 = vcmp.eq.s32.totalorder %v405_v46, %v419_v57 }
 0x75c   : > { %v421_v58 = vsel %vm420_vm11, -inf, %v401_v44 }
 0x75d   : > { %422 = vmax.xlane.f32.xlu0 %v421_v58 }
 0x7ea   : > { %v1567_v59 = vpop.xlane.xlu0 %422 }
 0x7eb   : > { %vm424_vm12 = vcmp.eq.f32.partialorder %v421_v58, %v1567_v59 }
 0x7ec   : > { %v425_v60 = vsel %vm424_vm12, %v1549_v2, 128 }
 0x7ed   : > { %v427_v61 = vshra.s32 %v425_v60, 16  ;;  %v426_v63 = vand.u32 65535, %v425_v60 }
 0x7ef   : > { %v429_v62 = vcvt.s32.f32 %v427_v61  ;;  %v428_v1 = vcvt.s32.f32 %v426_v63 }
 0x7f1   : > { %430 = vmin.xlane.f32.xlu1 %v429_v62 }
 0x87e   : > { %v431_v0 = vpop.xlane.xlu1 %430 }
 0x87f   : > { %vm432_vm13 = vcmp.eq.f32.partialorder %v429_v62, %v431_v0  ;;  %v437_v5 = vcvt.f32.s32 %v431_v0 }
 0x880   : > { %v433_v4 = vsel %vm432_vm13, %v428_v1, inf }
 0x881   : > { %434 = vmin.xlane.f32.xlu0 %v433_v4  ;;  %v438_v7 = vshll.u32 %v437_v5, 16 }
 0x90e   : > { %v435_v6 = vpop.xlane.xlu0 %434 }
 0x90f   : > { %v436_v8 = vcvt.f32.s32 %v435_v6 }
 0x911   : > { %v439_v9 = vadd.s32 %v438_v7, %v436_v8 }
 0x913   : > { %vm440_vm14 = vcmp.eq.s32.totalorder %v425_v60, %v439_v9  ;;  %v568_v9 = vstv %s1587_s23  ;;  %s1642_s23 = sld [smem:[#allocation3 + $0x10]] }
 0x914   : > { %v441_v10 = vsel %vm440_vm14, -inf, %v421_v58 }
 0x915   : > { %442 = vmax.xlane.f32.xlu1 %v441_v10 }
 0x9a2   : > { %v1571_v11 = vpop.xlane.xlu1 %442 }
 0x9a3   : > { %vm444_vm15 = vcmp.eq.f32.partialorder %v441_v10, %v1571_v11 }
 0x9a4   : > { %v445_v12 = vsel %vm444_vm15, %v1549_v2, 128 }
 0x9a5   : > { %v447_v13 = vshra.s32 %v445_v12, 16  ;;  %v446_v15 = vand.u32 65535, %v445_v12 }
 0x9a7   : > { %v449_v14 = vcvt.s32.f32 %v447_v13  ;;  %v448_v18 = vcvt.s32.f32 %v446_v15  ;;  %v697_v13 = vstv %s1593_s30  ;;  %v528_v15 = vstv %s1595_s24  ;;  %s1655_s30 = sld [smem:[#allocation3 + $0x13]]  ;;  %s1657_s24 = sld [smem:[#allocation3 + $0x14]] }
 0x9a9   : > { %450 = vmin.xlane.f32.xlu0 %v449_v14 }
 0xa36   : > { %v451_v16 = vpop.xlane.xlu0 %450 }
 0xa37   : > { %vm452_vm0 = vcmp.eq.f32.partialorder %v449_v14, %v451_v16  ;;  %v457_v20 = vcvt.f32.s32 %v451_v16  ;;  %v571_v16 = vstv %s1597_s10  ;;  %s1674_s10 = sld [smem:[#allocation3 + $0x18]] }
 0xa38   : > { %v453_v19 = vsel %vm452_vm0, %v448_v18, inf  ;;  %v531_v18 = vstv %s1605_s14  ;;  %s1699_s14 = sld [smem:[#allocation3 + $0x1f]] }
 0xa39   : > { %454 = vmin.xlane.f32.xlu1 %v453_v19  ;;  %v458_v22 = vshll.u32 %v457_v20, 16  ;;  %v614_v19 = vstv %s1599_s16  ;;  %v657_v20 = vstv %s1601_s18  ;;  %s1676_s16 = sld [smem:[#allocation3 + $0x19]]  ;;  %s1687_s18 = sld [smem:[#allocation3 + $0x1d]] }
 0xac6   : > { %v455_v21 = vpop.xlane.xlu1 %454 }
 0xac7   : > { %v456_v23 = vcvt.f32.s32 %v455_v21  ;;  %v700_v21 = vstv %s1603_s19  ;;  %s1695_s19 = sld [smem:[#allocation3 + $0x1e]] }
 0xac9   : > { %v459_v24 = vadd.s32 %v458_v22, %v456_v23  ;;  %v569_v22 = vmul.f32 %v568_v9, %v1551_v3  ;;  %v574_v23 = vstv %s1607_s21  ;;  %s1705_s21 = sld [smem:[#allocation3 + $0x20]] }
 0xacb   : > { %vm460_vm1 = vcmp.eq.s32.totalorder %v445_v12, %v459_v24  ;;  %v654_v12 = vstv %s1591_s20  ;;  %v617_v24 = vstv %s1609_s9  ;;  %s1650_s20 = sld [smem:[#allocation3 + $0x12]]  ;;  %s1707_s9 = sld [smem:[#allocation3 + $0x21]] }
 0xacc   : > { %v461_v25 = vsel %vm460_vm1, -inf, %v441_v10  ;;  %v611_v10 = vstv %s1589_s25  ;;  %s1648_s25 = sld [smem:[#allocation3 + $0x11]] }
 0xacd   : > { %462 = vmax.xlane.f32.xlu0 %v461_v25 }
 0xb5a   : > { %v1575_v26 = vpop.xlane.xlu0 %462 }
 0xb5b   : > { %vm464_vm2 = vcmp.eq.f32.partialorder %v461_v25, %v1575_v26 }
 0xb5c   : > { %v465_v27 = vsel %vm464_vm2, %v1549_v2, 128 }
 0xb5d   : > { %v467_v28 = vshra.s32 %v465_v27, 16  ;;  %v466_v30 = vand.u32 65535, %v465_v27 }
 0xb5f   : > { %v469_v29 = vcvt.s32.f32 %v467_v28  ;;  %v468_v33 = vcvt.s32.f32 %v466_v30  ;;  %v655_v28 = vmul.f32 %v654_v12, %v1551_v3  ;;  %v535_v30 = vstv %s1615_s1  ;;  %s1665_s1 = sld [smem:[#allocation3 + $0x16]] }
 0xb61   : > { %470 = vmin.xlane.f32.xlu1 %v469_v29 }
 0xbee   : > { %v471_v32 = vpop.xlane.xlu1 %470 }
 0xbef   : > { %vm472_vm3 = vcmp.eq.f32.partialorder %v469_v29, %v471_v32  ;;  %v477_v35 = vcvt.f32.s32 %v471_v32  ;;  %v703_v29 = vstv %s1613_s0  ;;  %v698_v32 = vmul.f32 %v697_v13, %v1551_v3  ;;  %s1663_s0 = sld [smem:[#allocation3 + $0x15]] }
 0xbf0   : > { %v473_v34 = vsel %vm472_vm3, %v468_v33, inf }
 0xbf1   : > { %474 = vmin.xlane.f32.xlu0 %v473_v34  ;;  %v478_v37 = vshll.u32 %v477_v35, 16  ;;  %v532_v34 = vmul.f32 %v531_v18, %v1555_v17  ;;  %v578_v35 = vstv %s1617_s2  ;;  %s1671_s2 = sld [smem:[#allocation3 + $0x17]] }
 0xbf7   : > { %v672_v13 = vstv %s1671_s2  ;;  %s1746_s2 = sld [smem:[#allocation3 + $0x2b]] }
 0xc7e   : > { %v475_v36 = vpop.xlane.xlu0 %474 }
 0xc7f   : > { %v476_v38 = vcvt.f32.s32 %v475_v36  ;;  %v575_v36 = vmul.f32 %v574_v23, %v1555_v17  ;;  %v673_v23 = vmul.f32 %v672_v13, %v1567_v59 }
 0xc81   : > { %v479_v39 = vadd.s32 %v478_v37, %v476_v38  ;;  %v618_v37 = vmul.f32 %v617_v24, %v1555_v17 }
 0xc83   : > { %vm480_vm4 = vcmp.eq.s32.totalorder %v465_v27, %v479_v39  ;;  %v612_v27 = vmul.f32 %v611_v10, %v1551_v3  ;;  %v621_v39 = vstv %s1619_s3  ;;  %s1679_s3 = sld [smem:[#allocation3 + $0x1a]] }
 0xc84   : > { %v481_v40 = vsel %vm480_vm4, -inf, %v461_v25  ;;  %v660_v25 = vstv %s1611_s15  ;;  %s1713_s15 = sld [smem:[#allocation3 + $0x22]] }
 0xc85   : > { %482 = vmax.xlane.f32.xlu1 %v481_v40  ;;  %v661_v38 = vmul.f32 %v660_v25, %v1555_v17 }
 0xd12   : > { %v1579_v41 = vpop.xlane.xlu1 %482 }
 0xd13   : > { %vm484_vm5 = vcmp.eq.f32.partialorder %v481_v40, %v1579_v41 }
 0xd14   : > { %v485_v42 = vsel %vm484_vm5, %v1549_v2, 128 }
 0xd15   : > { %v487_v43 = vshra.s32 %v485_v42, 16  ;;  %v486_v46 = vand.u32 65535, %v485_v42 }
 0xd17   : > { %v489_v44 = vcvt.s32.f32 %v487_v43  ;;  %v488_v48 = vcvt.s32.f32 %v486_v46  ;;  %v707_v43 = vstv %s1623_s5  ;;  %v572_v46 = vadd.f32 %v571_v16, %v569_v22  ;;  %s1685_s5 = sld [smem:[#allocation3 + $0x1c]] }
 0xd18   : > { %v715_v16 = vstv %s1674_s10  ;;  %v590_v22 = vstv %s1679_s3  ;;  %s1748_s10 = sld [smem:[#allocation3 + $0x2c]]  ;;  %s1757_s3 = sld [smem:[#allocation3 + $0x2e]] }
 0xd19   : > { %490 = vmin.xlane.f32.xlu0 %v489_v44 }
 0xd1d   : > { %v676_v25 = vstv %s1685_s5  ;;  %s1762_s5 = sld [smem:[#allocation3 + $0x30]] }
 0xda6   : > { %v491_v47 = vpop.xlane.xlu0 %490 }
 0xda7   : > { %vm492_vm6 = vcmp.eq.f32.partialorder %v489_v44, %v491_v47  ;;  %v497_v50 = vcvt.f32.s32 %v491_v47  ;;  %v536_v44 = vmul.f32 %v535_v30, %v1559_v31  ;;  %v615_v47 = vadd.f32 %v614_v19, %v612_v27 }
 0xda8   : > { %v493_v49 = vsel %vm492_vm6, %v488_v48, inf  ;;  %v579_v48 = vmul.f32 %v578_v35, %v1559_v31  ;;  %v716_v30 = vmul.f32 %v715_v16, %v1567_v59  ;;  %v591_v35 = vmul.f32 %v590_v22, %v1571_v11 }
 0xda9   : > { %494 = vmin.xlane.f32.xlu1 %v493_v49  ;;  %v498_v52 = vshll.u32 %v497_v50, 16  ;;  %v658_v49 = vadd.f32 %v657_v20, %v655_v28  ;;  %v701_v50 = vadd.f32 %v700_v21, %v698_v32  ;;  %v547_v21 = vstv %s1676_s16  ;;  %s1753_s16 = sld [smem:[#allocation3 + $0x2d]] }
 0xe36   : > { %v495_v51 = vpop.xlane.xlu1 %494 }
 0xe37   : > { %v496_v53 = vcvt.f32.s32 %v495_v51 }
 0xe39   : > { %v499_v54 = vadd.s32 %v498_v52, %v496_v53  ;;  %v576_v52 = vadd.f32 %v575_v36, %v572_v46  ;;  %v594_v46 = vstv %s1699_s14  ;;  %s1772_s14 = sld [smem:[#allocation9]] }
 0xe3b   : > { %vm500_vm7 = vcmp.eq.s32.totalorder %v485_v42, %v499_v54  ;;  %v664_v42 = vstv %s1621_s4  ;;  %s1681_s4 = sld [smem:[#allocation3 + $0x1b]]  ;;  %v708_v54 = vmul.f32 %v707_v43, %v1559_v31 }
 0xe3c   : > { %v501_v55 = vsel %vm500_vm7, -inf, %v481_v40  ;;  %v704_v40 = vmul.f32 %v703_v29, %v1555_v17  ;;  %v622_v17 = vmul.f32 %v621_v39, %v1559_v31  ;;  %v665_v53 = vmul.f32 %v664_v42, %v1559_v31 }
 0xe3d   : > { %502 = vmax.xlane.f32.xlu0 %v501_v55  ;;  %v543_v31 = vstv %s1657_s24  ;;  %s1734_s24 = sld [smem:[#allocation3 + $0x28]] }
 0xe3e   : > { %v544_v18 = vmul.f32 %v543_v31, %v1567_v59 }
 0xe41   : > { %v633_v24 = vstv %s1681_s4  ;;  %s1759_s4 = sld [smem:[#allocation3 + $0x2f]] }
 0xe42   : > { %v634_v36 = vmul.f32 %v633_v24, %v1571_v11 }
 0xeca   : > { %v1583_v56 = vpop.xlane.xlu0 %502 }
 0xecb   : > { %vm504_vm8 = vcmp.eq.f32.partialorder %v501_v55, %v1583_v56 }
 0xecc   : > { %v505_v57 = vsel %vm504_vm8, %v1549_v2, 128  ;;  %v525_v2 = vstv %s524_s17  ;;  %s1640_s17 = sld [smem:[#allocation3 + $0xf]] }
 0xecd   : > { %v507_v58 = vshra.s32 %v505_v57, 16  ;;  %v506_v61 = vand.u32 65535, %v505_v57  ;;  %v526_v14 = vmul.f32 %v525_v2, %v1551_v3  ;;  %v629_v2 = vstv %s1665_s1  ;;  %s1740_s1 = sld [smem:[#allocation3 + $0x2a]] }
 0xece   : > { %v630_v20 = vmul.f32 %v629_v2, %v1567_v59 }
 0xecf   : > { %v509_v60 = vcvt.s32.f32 %v507_v58  ;;  %v508_v63 = vcvt.s32.f32 %v506_v61  ;;  %v529_v33 = vadd.f32 %v528_v15, %v526_v14  ;;  %v705_v58 = vadd.f32 %v704_v40, %v701_v50 }
 0xed0   : > { %v580_v61 = vadd.f32 %v579_v48, %v576_v52  ;;  %v680_v48 = vstv %s1707_s9  ;;  %s1780_s9 = sld [smem:[#allocation8 + $0xa]] }
 0xed1   : > { %510 = vmin.xlane.f32.xlu1 %v509_v60  ;;  %v533_v51 = vadd.f32 %v532_v34, %v529_v33  ;;  %v548_v34 = vmul.f32 %v547_v21, %v1571_v11 }
 0xf5e   : > { %v511_v62 = vpop.xlane.xlu1 %510 }
 0xf5f   : > { %vm512_vm9 = vcmp.eq.f32.partialorder %v509_v60, %v511_v62  ;;  %v517_v1 = vcvt.f32.s32 %v511_v62  ;;  %v537_v60 = vadd.f32 %v536_v44, %v533_v51  ;;  %v539_v62 = vstv %s1640_s17  ;;  %s1719_s17 = sld [smem:[#allocation3 + $0x23]] }
 0xf60   : > { %v513_v0 = vsel %vm512_vm9, %v508_v63, inf  ;;  %v582_v63 = vstv %s1642_s23  ;;  %v540_v9 = vmul.f32 %v539_v62, %v1563_v45  ;;  %s1721_s23 = sld [smem:[#allocation3 + $0x24]] }
 0xf61   : > { %514 = vmin.xlane.f32.xlu0 %v513_v0  ;;  %v518_v5 = vshll.u32 %v517_v1, 16  ;;  %v625_v0 = vstv %s1648_s25  ;;  %v583_v10 = vmul.f32 %v582_v63, %v1563_v45  ;;  %s1727_s25 = sld [smem:[#allocation3 + $0x25]] }
 0xf62   : > { %v626_v12 = vmul.f32 %v625_v0, %v1563_v45  ;;  %v541_v27 = vadd.f32 %v540_v9, %v537_v60 }
 0xf63   : > { %v584_v28 = vadd.f32 %v583_v10, %v580_v61 }
 0xf64   : > { %v545_v39 = vadd.f32 %v544_v18, %v541_v27  ;;  %v563_v27 = vstv %s1753_s16  ;;  %s1838_s16 = sld [smem:[#allocation8 + $0x12]] }
 0xf66   : > { %v598_v60 = vstv %s1721_s23  ;;  %s1793_s23 = sld [smem:[#allocation8 + $0x1]] }
 0xf67   : > { %v641_v62 = vstv %s1727_s25  ;;  %s1795_s25 = sld [smem:[#allocation9 + $0x1]] }
 0xf68   : > { %v642_v2 = vmul.f32 %v641_v62, %v1579_v41 }
 0xfee   : > { %v515_v4 = vpop.xlane.xlu0 %514 }
 0xfef   : > { %v516_v6 = vcvt.f32.s32 %v515_v4  ;;  %v668_v4 = vstv %s1650_s20  ;;  %s1729_s20 = sld [smem:[#allocation3 + $0x26]] }
 0xff0   : > { %v669_v14 = vmul.f32 %v668_v4, %v1563_v45 }
 0xff1   : > { %v519_v7 = vadd.s32 %v518_v5, %v516_v6  ;;  %v711_v5 = vstv %s1655_s30  ;;  %s1732_s30 = sld [smem:[#allocation3 + $0x27]] }
 0xff2   : > { %v712_v15 = vmul.f32 %v711_v5, %v1563_v45  ;;  %v719_v45 = vstv %s1687_s18  ;;  %s1764_s18 = sld [smem:[#allocation3 + $0x31]]  ;;  %v559_v5 = vstv %s1734_s24  ;;  %s1806_s24 = sld [smem:[#allocation8 + $0x10]] }
 0xff3   : > { %vm520_vm10 = vcmp.eq.s32.totalorder %v505_v57, %v519_v7  ;;  %v662_v57 = vadd.f32 %v661_v38, %v658_v49  ;;  %v709_v7 = vadd.f32 %v708_v54, %v705_v58  ;;  %v551_v38 = vstv %s1695_s19  ;;  %s1770_s19 = sld [smem:[#allocation8]] }
 0xff4   : > { %v521_v8 = vsel %vm520_vm10, -inf, %v501_v55  ;;  %v619_v55 = vadd.f32 %v618_v37, %v615_v47  ;;  %v720_v37 = vmul.f32 %v719_v45, %v1571_v11  ;;  %v637_v47 = vstv %s1705_s21  ;;  %s1778_s21 = sld [smem:[#allocation8 + $0x5]] }
 0xff5   : > { %522 = vmax.xlane.f32.xlu1 %v521_v8  ;;  %v666_v6 = vadd.f32 %v665_v53, %v662_v57  ;;  %v586_v8 = vstv %s1663_s0  ;;  %v713_v33 = vadd.f32 %v712_v15, %v709_v7  ;;  %s1738_s0 = sld [smem:[#allocation3 + $0x29]]  ;;  %v549_v49 = vadd.f32 %v548_v34, %v545_v39 }
 0xff6   : > { %v623_v1 = vadd.f32 %v622_v17, %v619_v55  ;;  %v587_v19 = vmul.f32 %v586_v8, %v1567_v59  ;;  %v677_v59 = vmul.f32 %v676_v25, %v1571_v11  ;;  %v723_v11 = vstv %s1713_s15  ;;  %s1785_s15 = sld [smem:[#allocation8 + $0xf]] }
 0xff7   : > { %v670_v32 = vadd.f32 %v669_v14, %v666_v6  ;;  %v717_v44 = vadd.f32 %v716_v30, %v713_v33  ;;  %v552_v51 = vmul.f32 %v551_v38, %v1575_v26  ;;  %v555_v54 = vstv %s1719_s17  ;;  %s1787_s17 = sld [smem:[#allocation8 + $0x14]] }
 0xff8   : > { %v627_v29 = vadd.f32 %v626_v12, %v623_v1  ;;  %v588_v40 = vadd.f32 %v587_v19, %v584_v28  ;;  %v595_v55 = vmul.f32 %v594_v46, %v1575_v26  ;;  %v638_v57 = vmul.f32 %v637_v47, %v1575_v26 }
 0xff9   : > { %v674_v43 = vadd.f32 %v673_v23, %v670_v32  ;;  %v721_v53 = vadd.f32 %v720_v37, %v717_v44  ;;  %v681_v58 = vmul.f32 %v680_v48, %v1575_v26  ;;  %v724_v61 = vmul.f32 %v723_v11, %v1575_v26 }
 0xffa   : > { %v631_v42 = vadd.f32 %v630_v20, %v627_v29  ;;  %v592_v50 = vadd.f32 %v591_v35, %v588_v40  ;;  %v684_v63 = vstv %s1729_s20  ;;  %v727_v0 = vstv %s1732_s30  ;;  %s1800_s20 = sld [smem:[#allocation8 + $0x6]]  ;;  %s1802_s30 = sld [smem:[#allocation8 + $0xb]] }
 0xffb   : > { %v678_v52 = vadd.f32 %v677_v59, %v674_v43  ;;  %v556_v1 = vmul.f32 %v555_v54, %v1579_v41  ;;  %v553_v4 = vadd.f32 %v552_v51, %v549_v49  ;;  %v602_v31 = vstv %s1738_s0  ;;  %s1808_s0 = sld [smem:[#allocation8 + $0x15]] }
 0xffc   : > { %v635_v17 = vadd.f32 %v634_v36, %v631_v42  ;;  %v599_v6 = vmul.f32 %v598_v60, %v1579_v41  ;;  %v645_v7 = vstv %s1740_s1  ;;  %v688_v26 = vstv %s1746_s2  ;;  %s1813_s1 = sld [smem:[#allocation8 + $0x2]] }
 0xffd   : > { %v731_v8 = vstv %s1748_s10  ;;  %v685_v9 = vmul.f32 %v684_v63, %v1579_v41  ;;  %v728_v10 = vmul.f32 %v727_v0, %v1579_v41  ;;  %v596_v12 = vadd.f32 %v595_v55, %v592_v50  ;;  %s1815_s2 = sld [smem:[#allocation9 + $0x2]]  ;;  %s1817_s10 = sld [smem:[#allocation8 + $0x7]] }
 0xffe   : > { %v560_v13 = vmul.f32 %v559_v5, %v1583_v56  ;;  %v603_v14 = vmul.f32 %v602_v31, %v1583_v56  ;;  %v639_v15 = vadd.f32 %v638_v57, %v635_v17  ;;  %v682_v16 = vadd.f32 %v681_v58, %v678_v52 }
 0xfff   : > { %v646_v18 = vmul.f32 %v645_v7, %v1583_v56  ;;  %v689_v19 = vmul.f32 %v688_v26, %v1583_v56  ;;  %v725_v41 = vadd.f32 %v724_v61, %v721_v53  ;;  %v732_v20 = vmul.f32 %v731_v8, %v1583_v56 }
0x1000   : > { %v557_v21 = vadd.f32 %v556_v1, %v553_v4  ;;  %v600_v22 = vadd.f32 %v599_v6, %v596_v12  ;;  %v643_v23 = vadd.f32 %v642_v2, %v639_v15  ;;  %v686_v24 = vadd.f32 %v685_v9, %v682_v16 }
0x1001   : > { %v729_v25 = vadd.f32 %v728_v10, %v725_v41  ;;  %v606_v32 = vstv %s1757_s3  ;;  %v649_v33 = vstv %s1759_s4  ;;  %v692_v34 = vstv %s1762_s5  ;;  %s1846_s3 = sld [smem:[#allocation8 + $0x4]]  ;;  %s1854_s5 = sld [smem:[#allocation8 + $0x9]] }
0x1002   : > { %v561_v56 = vadd.f32 %v560_v13, %v557_v21  ;;  %v604_v45 = vadd.f32 %v603_v14, %v600_v22  ;;  %v647_v28 = vadd.f32 %v646_v18, %v643_v23  ;;  %v690_v29 = vadd.f32 %v689_v19, %v686_v24  ;;  %s1852_s4 = sld [smem:[#allocation9 + $0x4]] }
0x1003   : > { %v733_v30 = vadd.f32 %v732_v20, %v729_v25  ;;  %v735_v35 = vstv %s1764_s18  ;;  %v740_v36 = vstv %s1770_s19  ;;  %v743_v59 = vstv %s1772_s14  ;;  %s1860_s18 = sld [smem:[#allocation8 + $0xe]]  ;;  %s1862_s19 = sld [smem:[#allocation8 + $0x13]] }
0x1004   : > { %v746_v37 = vstv %s1778_s21  ;;  %v750_v38 = vstv %s1780_s9  ;;  %v754_v39 = vstv %s1785_s15  ;;  %v758_v40 = vstv %s1787_s17  ;;  %s1868_s14 = sld [smem:[#allocation8 + $0x18]]  ;;  %s1114_s9 = sshll.u32 %s1435_s6, 7 }
0x1005   : > { %v763_v42 = vstv %s1793_s23  ;;  %v766_v43 = vstv %s1795_s25  ;;  %v769_v44 = vstv %s1800_s20  ;;  %v773_v46 = vstv %s1802_s30  ;;  %s1870_s21 = sld [smem:[#allocation11]]  ;;  %s2010_s25 = sld [smem:[#allocation30_spill]] }
0x1006   : > { %v777_v47 = vstv %s1806_s24  ;;  %v781_v48 = vstv %s1808_s0  ;;  %v786_v49 = vstv %s1813_s1  ;;  %v789_v50 = vstv %s1815_s2  ;;  %s1370_s6 = smov [#allocation12]  }
0x1007   : > { %v792_v11 = vstv %s1817_s10  ;;  %v796_v51 = vstv %s1819_s11  ;;  %v800_v57 = vstv %s1821_s28  ;;  %v804_v58 = vstv %s1823_s8  ;;  %s1894_s28 = sld [smem:[#allocation11 + $0x2]]  ;;  %s1112_s8 = sld [smem:[#allocation11 + $0x4]] }
0x1008   : > { %v809_v60 = vstv %s1825_s13  ;;  %v812_v4 = vstv %s1828_s26  ;;  %v815_v5 = vstv %s1830_s29  ;;  %v819_v31 = vstv %s1836_s7  ;;  %s1889_s7 = sld [smem:[#allocation2]]  ;;  %s1899_s29 = sld [smem:[#allocation11 + $0x3]] }
0x1009   : > { %v823_v7 = vstv %s1838_s16  ;;  %v827_v9 = vstv %s1844_s12  ;;  %v832_v10 = vstv %s1846_s3  ;;  %v835_v14 = vstv %s1852_s4  ;;  %s1892_s26 = sld [smem:[#allocation11 + $0x1]]  ;;  %s2009_s11 = sld [smem:[#allocation22_spill]] }
0x100a   : > { %v838_v15 = vstv %s1854_s5  ;;  %v842_v16 = vstv %s1860_s18  ;;  %v846_v19 = vstv %s1862_s19  ;;  %v850_v41 = vstv %s1868_s14  ;;  %s332_s12 = sand.u32 1, %s1355_s27   ;;  %s1293_s0 = sshll.u32 %s1370_s6, 4  ;;  %s1294_s0 = int_to_ptr.vmem [resolvable:$false] %s1293_s0 }
0x100b   : > { %v855_v20 = vstv %s1870_s21  ;;  %s1026_s13 = sshll.u32 %s332_s12, 3  ;;  %s1915_s20 = scalar_lea.hbm %s2010_s25, %s1114_s9 }
0x100c   : > { %s334_s15 = scalar_lea.vmem [#allocation12], %s1026_s13  ;;  %s890_s30 = scalar_lea.sflag [#allocation4], %s332_s12 }
0x100d   : > { %s903_s17 = sshll.u32 %s334_s15, 4  ;;  %s1295_s1 = scalar_lea.vmem %s1294_s0, 256  ;;  %s1917_s17 = int_to_ptr.vmem [resolvable:$true] %s903_s17 }
0x100e   : > { %s1289_s24 = scalar_lea.vmem %s1917_s17, 128  ;;  %p1296_p6 = scmp.lt.s32.totalorder %s1917_s17, %s1294_s0 }
0x100f   : > { %p1290_p9 = scmp.ne.s32.totalorder %s1917_s17, %s1289_s24  ;;  %p2011_p7 = scmp.ne.s32.totalorder %s2009_s11, 0 }
0x1010   : > { %p1297_p10 = scmp.lt.s32.totalorder %s1295_s1, %s1289_s24 }
0x1011   : > { %p1291_p8 = pnand %p1290_p9, %p2011_p7 }
0x1012   : > { %p1298_p11 = por %p1297_p10, %p1296_p6 }
0x1013   : > { %p1292_p5 = pneg %p1291_p8 }
0x1015   : > { %p1299_p13 = pnand %p1298_p11, %p1292_p5 }
0x1082   : > { %v523_v17 = vpop.xlane.xlu1 %522 }
0x1083   : > { %v564_v52 = vmul.f32 %v563_v27, %v523_v17  ;;  %v607_v53 = vmul.f32 %v606_v32, %v523_v17  ;;  %v650_v54 = vmul.f32 %v649_v33, %v523_v17  ;;  %v693_v55 = vmul.f32 %v692_v34, %v523_v17 }
0x1084   : > { %v736_v61 = vmul.f32 %v735_v35, %v523_v17 }
0x1085   : > { %v565_v62 = vadd.f32 %v564_v52, %v561_v56  ;;  %v608_v63 = vadd.f32 %v607_v53, %v604_v45  ;;  %v651_v0 = vadd.f32 %v650_v54, %v647_v28  ;;  %v694_v1 = vadd.f32 %v693_v55, %v690_v29 }
0x1086   : > { %v737_v6 = vadd.f32 %v736_v61, %v733_v30 }
0x1087   : > { %v566_v26 = vmax.f32 %v565_v62, 0.0  ;;  %v609_v8 = vmax.f32 %v608_v63, 0.0  ;;  %v652_v2 = vmax.f32 %v651_v0, 0.0  ;;  %v695_v12 = vmax.f32 %v694_v1, 0.0 }
0x1088   : > { %v1881_v13 = vmax.f32 %v737_v6, 0.0 }
0x1089   : > { %v741_v18 = vmul.f32 %v740_v36, %v566_v26  ;;  %v764_v21 = vmul.f32 %v763_v42, %v566_v26  ;;  %v747_v23 = vmul.f32 %v746_v37, %v609_v8  ;;  %v751_v24 = vmul.f32 %v750_v38, %v652_v2 }
0x108a   : > { %v787_v25 = vmul.f32 %v786_v49, %v566_v26  ;;  %v755_v56 = vmul.f32 %v754_v39, %v695_v12  ;;  %v759_v45 = vmul.f32 %v758_v40, %v1881_v13  ;;  %v770_v28 = vmul.f32 %v769_v44, %v609_v8 }
0x108b   : > { %v744_v22 = vadd.f32 %v743_v59, %v741_v18  ;;  %v767_v27 = vadd.f32 %v766_v43, %v764_v21  ;;  %v793_v32 = vmul.f32 %v792_v11, %v609_v8  ;;  %v810_v33 = vmul.f32 %v809_v60, %v566_v26 }
0x108c   : > { %v790_v30 = vadd.f32 %v789_v50, %v787_v25  ;;  %v774_v35 = vmul.f32 %v773_v46, %v652_v2  ;;  %v778_v36 = vmul.f32 %v777_v47, %v695_v12  ;;  %v797_v59 = vmul.f32 %v796_v51, %v652_v2 }
0x108d   : > { %v748_v29 = vadd.f32 %v747_v23, %v744_v22  ;;  %v771_v34 = vadd.f32 %v770_v28, %v767_v27  ;;  %v813_v42 = vadd.f32 %v812_v4, %v810_v33  ;;  %v816_v49 = vmul.f32 %v815_v5, %v609_v8 }
0x108e   : > { %v794_v38 = vadd.f32 %v793_v32, %v790_v30  ;;  %v782_v40 = vmul.f32 %v781_v48, %v1881_v13  ;;  %v801_v43 = vmul.f32 %v800_v57, %v695_v12  ;;  %v833_v44 = vmul.f32 %v832_v10, %v566_v26 }
0x108f   : > { %v752_v37 = vadd.f32 %v751_v24, %v748_v29  ;;  %v775_v39 = vadd.f32 %v774_v35, %v771_v34  ;;  %v817_v17 = vadd.f32 %v816_v49, %v813_v42  ;;  %v820_v52 = vmul.f32 %v819_v31, %v652_v2 }
0x1090   : > { %v798_v11 = vadd.f32 %v797_v59, %v794_v38  ;;  %v805_v47 = vmul.f32 %v804_v58, %v1881_v13  ;;  %v836_v51 = vadd.f32 %v835_v14, %v833_v44  ;;  %v839_v53 = vmul.f32 %v838_v15, %v609_v8 }
0x1091   : > { %v756_v50 = vadd.f32 %v755_v56, %v752_v37  ;;  %v779_v46 = vadd.f32 %v778_v36, %v775_v39  ;;  %v821_v60 = vadd.f32 %v820_v52, %v817_v17  ;;  %v824_v61 = vmul.f32 %v823_v7, %v695_v12 }
0x1092   : > { %v802_v55 = vadd.f32 %v801_v43, %v798_v11  ;;  %v858_v48 = vstv %s1889_s7  ;;  %v840_v62 = vadd.f32 %v839_v53, %v836_v51  ;;  %v843_v63 = vmul.f32 %v842_v16, %v652_v2 }
0x1093   : > { %v760_v54 = vadd.f32 %v759_v45, %v756_v50  ;;  %v783_v57 = vadd.f32 %v782_v40, %v779_v46  ;;  %v825_v4 = vadd.f32 %v824_v61, %v821_v60  ;;  %v828_v5 = vmul.f32 %v827_v9, %v1881_v13 }
0x1094   : > { %v806_v1 = vadd.f32 %v805_v47, %v802_v55  ;;  %v861_v58 = vstv %s1892_s26  ;;  %v844_v6 = vadd.f32 %v843_v63, %v840_v62  ;;  %v847_v26 = vmul.f32 %v846_v19, %v695_v12 }
0x1095   : > { %v761_v0 = vmax.f32 %v760_v54, 0.0  ;;  %v784_v31 = vmax.f32 %v783_v57, 0.0  ;;  %v829_v10 = vadd.f32 %v828_v5, %v825_v4  ;;  %v865_v7 = vstv %s1894_s28 }
0x1096   : > { %v807_v8 = vmax.f32 %v806_v1, 0.0  ;;  %v848_v15 = vadd.f32 %v847_v26, %v844_v6  ;;  %v851_v18 = vmul.f32 %v850_v41, %v1881_v13  ;;  %v869_v16 = vstv %s1899_s29  ;;  %v1213_v41 = vld [vmem:[%s1546_s22] sm:$0xff] }
0x1097   : > { %v856_v14 = vmul.f32 %v855_v20, %v761_v0  ;;  %v830_v21 = vmax.f32 %v829_v10, 0.0  ;;  %v862_v2 = vmul.f32 %v861_v58, %v784_v31  ;;  %v873_v9 = vstv %s1112_s8 }
0x1098   : > { %v852_v23 = vadd.f32 %v851_v18, %v848_v15  ;;  %v866_v25 = vmul.f32 %v865_v7, %v807_v8  ;;  %v880_v30 = vsub.f32 %v1213_v41, %v1551_v3 }
0x1099   : > { %v859_v22 = vadd.f32 %v858_v48, %v856_v14  ;;  %v870_v27 = vmul.f32 %v869_v16, %v830_v21 }
0x109a   : > { %v853_v56 = vmax.f32 %v852_v23, 0.0 }
0x109b   : > { %v863_v24 = vadd.f32 %v862_v2, %v859_v22 }
0x109c   : > { %v874_v12 = vmul.f32 %v873_v9, %v853_v56 }
0x109d   : > { %v867_v45 = vadd.f32 %v866_v25, %v863_v24 }
0x109f   : > { %v871_v19 = vadd.f32 %v870_v27, %v867_v45 }
0x10a1   : > { %v875_v20 = vadd.f32 %v874_v12, %v871_v19 }
0x10a3   : > { %v876_v28 = vand.u32 2147483647, %v875_v20 }
0x10a5   : > { %v877_v29 = vmax.f32 %v876_v28, 1e-12 }
0x10a7   : > { %v878_v13 = vmin.f32 %v877_v29, 1e+12 }
0x10a9   : > { %1207 = vrcp.f32 %v878_v13 }
0x10b3   : > { %v1208_v32 = vpop.eup %1207 }
0x10b4   : > { %v881_v33 = vmul.f32 %v1208_v32, %v880_v30 }
0x10b6   : > { %v882_v34 = vmul.f32 1.442695, %v881_v33 }
0x10b8   : > { %1209 = vpow2.f32 %v882_v34 }
0x10c2   : > { %v1210_v35 = vpop.eup %1209 }
0x10c3   : > { %884 = vadd.xlane.f32.xlu0 %v1210_v35 }
0x1150   : > { %v885_v36 = vpop.xlane.xlu0 %884 }
0x1151   : > { %1211 = vrcp.f32 %v885_v36 }
0x115b   : > { %v1212_v59 = vpop.eup %1211 }
0x115c   : > { %v887_v37 = vmul.f32 %v1212_v59, %v1210_v35 }
0x115e   : > { %888 = vst [vmem:[%s334_s15] sm:$0xff] %v887_v37 }
0x115f   : > { %1302 = shalt.err (!%p1299_p13)
}
0x1160   : > { %s1303_s2 = scalar_lea.hbm %s1915_s20, 128  ;;  %s1307_s3 = scalar_lea.hbm %s2010_s25, 256 }
0x1161   : > { %p1304_p1 = scmp.ne.s32.totalorder %s1915_s20, %s1303_s2  ;;  %p1308_p3 = scmp.lt.u32.totalorder %s1915_s20, %s2010_s25 }
0x1162   : > { %p1309_p12 = scmp.lt.u32.totalorder %s1307_s3, %s1303_s2  ;;  %p1311_p9 = scmp.lt.u32.totalorder %s1303_s2, %s1915_s20 }
0x1163   : > { %p1305_p0 = pnand %p1304_p1, %p2011_p7 }
0x1164   : > { %p1310_p4 = por %p1309_p12, %p1308_p3 }
0x1165   : > { %p1306_p2 = pneg %p1305_p0 }
0x1166   : > { %p1312_p8 = por %p1311_p9, %p1310_p4 }
0x1168   : > { %p1313_p5 = pnand %p1312_p8, %p1306_p2 }
0x116a   : > { %1316 = shalt.err (!%p1313_p5)
}
0x116b   : > { %1137 = dma.vmem_to_hbm [thread:$0]  (%p2011_p7), %s1917_s17, 128, %s1915_s20, %s890_s30  }
0x116c PF: > { %s2012_s18 = sld [smem:[#allocation19_spill]]  ;;  %s2013_s19 = sld [smem:[#allocation17_spill]] }
0x116d   : > { %s2014_s14 = sld [smem:[#allocation23_spill]] }
0x1172   : > { %p1169_p6 = scmp.ge.s32.totalorder %s2012_s18, 2  ;;  %s915_s21 = sand.u32 1, %s2013_s19  }
0x1173   : > { %p2015_p10 = scmp.ne.s32.totalorder %s2014_s14, 0  ;;  %s916_s7 = scalar_lea.sflag [#allocation4], %s915_s21 }
0x1175   : > { %p1156_p11 = pnand %p1169_p6, %p2015_p10 }
0x1177   : > { %1346 = dma.done.wait (!%p1156_p11), %s916_s7, 128  }
0x1178   : > { %1348 = vsyncadd (!%p1156_p11), %s916_s7, 4294967168  ;;  %s2016_s29 = sld [smem:[#allocation20_spill]]  ;;  %s2017_s28 = sld [smem:[#allocation18_spill]] }
0x1179   : > { %s2018_s8 = sld [smem:[#allocation21_spill]]  ;;  %s2019_s26 = smov %s1355_s27 }
0x117e   : > { %p21_p13 = scmp.ge.s32.totalorder %s2016_s29, 4   ;;  %s2020_s27 = smov %s2017_s28 }
0x117f   : > { %s2021_s28 = smov %s2018_s8 }
0x1180   :  { %23 = sbr.rel (!%p21_p13) target bundleno = 15 (0xf), region = 104 }
0x1187   :  { %921 = vsyncpa [#allocation4], 1 }
0x1188   :  { %923 = vsyncpa [#allocation4 + $0x1], 1 }
0x1189   :  { %924 = vsyncpa [#allocation5], 1 }
0x118a   :  { %926 = vsyncpa [#allocation5 + $0x1], 1 }
0x118b   :  { %927 = vsyncpa [#allocation7], 1 }
0x118c   :  { %928 = vsyncpa [#allocation10], 1 }

</bundles_post_ra>
